<compile_context>
chip_gen: v6e
topology: v6e:2x2x1
jax: 0.10.0
libtpu: 0.0.40
codegen_flags: <defaults>
</compile_context>

<pallas_src>
import functools

import jax
import jax.numpy as jnp
from jax import lax
from jax.experimental import pallas as pl


# ----------------------------- fused decoder-layer kernel -----------------------------

def _decoder_layer_kernel(q_ref, kv_ref,
                          wqkv1_ref, bqkv1_ref, wo1_ref, bo1_ref, g1_ref, be1_ref,
                          wkv2_ref, bkv2_ref, wo2_ref, bo2_ref, g2_ref, be2_ref,
                          w1_ref, b1_ref, w2_ref, b2_ref, g3_ref, be3_ref,
                          o_ref, *, head_n, head_dim, inv_scale, eps):
    f32 = jnp.float32
    mxu_dtype = wqkv1_ref.dtype                      # bf16 weights -> bf16 MXU operands

    B, L, H = q_ref.shape
    S = kv_ref.shape[1]

    xq = q_ref[...].reshape(B * L, H).astype(f32)    # decoder stream, flattened
    xk = kv_ref[...].reshape(B * S, H)               # encoder stream, flattened

    def mm(a, w):
        # bf16 MXU matmul, f32 accumulation (softmax / LN math stays f32).
        return jnp.dot(a.astype(mxu_dtype), w, preferred_element_type=f32)

    def layer_norm(x, g_ref, b_ref):
        mu = jnp.mean(x, axis=-1, keepdims=True)
        xc = x - mu
        var = jnp.mean(xc * xc, axis=-1, keepdims=True)
        return xc * lax.rsqrt(var + eps) * g_ref[...] + b_ref[...]

    def mha_heads(q_scaled, k_all, v_all, wo, bo_ref):
        # q_scaled already carries 1/sqrt(head_dim).  Heads are statically unrolled;
        # each head's context is contracted directly against its slice of Wo
        # (fc_o(concat_h ctx_h) == sum_h ctx_h @ Wo[h]) so there is no concat/transpose.
        partials = []
        for h in range(head_n):
            sl = slice(h * head_dim, (h + 1) * head_dim)
            qh = q_scaled[:, sl].astype(mxu_dtype)
            kh = k_all[:, sl].astype(mxu_dtype)
            vh = v_all[:, sl].astype(mxu_dtype)
            e = lax.dot_general(qh, kh, (((1,), (1,)), ((), ())),
                                preferred_element_type=f32)          # (Lq, Lk)
            m = jnp.max(e, axis=-1, keepdims=True)
            p = jnp.exp(e - m)
            attn = p * pl.reciprocal(jnp.sum(p, axis=-1, keepdims=True), approx=True)
            ctx = jnp.dot(attn.astype(mxu_dtype), vh, preferred_element_type=f32)
            partials.append(jnp.dot(ctx.astype(mxu_dtype), wo[sl, :],
                                    preferred_element_type=f32))     # (Lq, H)
        # Balanced pairwise sum: independent adds instead of a serial accumulation chain.
        while len(partials) > 1:
            nxt = [partials[i] + partials[i + 1] for i in range(0, len(partials) - 1, 2)]
            if len(partials) % 2:
                nxt.append(partials[-1])
            partials = nxt
        return partials[0] + bo_ref[...]

    # ---- self-attention: fc_q/fc_k/fc_v fused into one (H, 3H) matmul ----------------
    qkv = mm(xq, wqkv1_ref[...]) + bqkv1_ref[...]                    # (B*L, 3H) f32
    wo1 = wo1_ref[...]
    first = []
    for b in range(B):
        r = slice(b * L, (b + 1) * L)
        first.append(mha_heads(qkv[r, 0:H] * inv_scale,
                               qkv[r, H:2 * H],
                               qkv[r, 2 * H:3 * H],
                               wo1, bo1_ref))
    target = layer_norm(xq + jnp.concatenate(first, axis=0), g1_ref, be1_ref)

    # ---- cross-attention: fc_q is None (query_dim=-1) -> Q = target directly;
    #      fc_k/fc_v fused into one (H, 2H) matmul over the encoder stream -------------
    kv = mm(xk, wkv2_ref[...]) + bkv2_ref[...]                       # (B*S, 2H) f32
    wo2 = wo2_ref[...]
    second = []
    for b in range(B):
        rq = slice(b * L, (b + 1) * L)
        rk = slice(b * S, (b + 1) * S)
        second.append(mha_heads(target[rq, :] * inv_scale,
                                kv[rk, 0:H],
                                kv[rk, H:2 * H],
                                wo2, bo2_ref))
    target = layer_norm(target + jnp.concatenate(second, axis=0), g2_ref, be2_ref)

    # ---- feed-forward (Conv1d kernel_size=1 == per-position linear), ReLU ------------
    hid = jnp.maximum(mm(target, w1_ref[...]) + b1_ref[...], 0.0)    # (B*L, F)
    ffn_out = mm(hid, w2_ref[...]) + b2_ref[...]                     # (B*L, H)
    target = layer_norm(target + ffn_out, g3_ref, be3_ref)

    o_ref[...] = target.reshape(B, L, H).astype(o_ref.dtype)


# ----------------------------- parameter prep (one-time) ------------------------------

def prepare_decoder_layer_params(p, mxu_dtype=jnp.bfloat16):
    """One-time layout work (outside the per-call path): transpose PyTorch (Dout, Din)
    weights to (Din, Dout), concatenate fused QKV / KV projections, reshape biases to
    (1, Dout), and store matmul weights in bf16 for native-MXU operands."""
    f32 = jnp.float32
    row = lambda v: jnp.asarray(v, f32).reshape(1, -1)
    return dict(
        wqkv1=jnp.concatenate([p["wq1"].T, p["wk1"].T, p["wv1"].T], axis=1).astype(mxu_dtype),
        bqkv1=jnp.concatenate([p["bq1"], p["bk1"], p["bv1"]]).reshape(1, -1).astype(f32),
        wo1=p["wo1"].T.astype(mxu_dtype), bo1=row(p["bo1"]),
        g1=row(p["g1"]), be1=row(p["be1"]),
        wkv2=jnp.concatenate([p["wk2"].T, p["wv2"].T], axis=1).astype(mxu_dtype),
        bkv2=jnp.concatenate([p["bk2"], p["bv2"]]).reshape(1, -1).astype(f32),
        wo2=p["wo2"].T.astype(mxu_dtype), bo2=row(p["bo2"]),
        g2=row(p["g2"]), be2=row(p["be2"]),
        w1=p["w_fc1"].T.astype(mxu_dtype), b1=row(p["b_fc1"]),
        w2=p["w_fc2"].T.astype(mxu_dtype), b2=row(p["b_fc2"]),
        g3=row(p["g3"]), be3=row(p["be3"]),
    )


# ----------------------------- wrapper -------------------------------------------------

def decoder_layer_forward(prep, query, key, *, head_n, eps=1e-5):
    """Inference forward of AttentionalTransformerDecoderLayer (dropout = identity).

    query: (B, L, H) decoder stream; key: (B, S, H) encoder stream (used as key & value).
    """
    B, L, H = query.shape
    S = key.shape[1]
    assert H % head_n == 0
    head_dim = H // head_n
    inv_scale = 1.0 / (float(head_dim) ** 0.5)
    F = prep["w1"].shape[1]

    operands = (query, key,
                prep["wqkv1"], prep["bqkv1"], prep["wo1"], prep["bo1"],
                prep["g1"], prep["be1"],
                prep["wkv2"], prep["bkv2"], prep["wo2"], prep["bo2"],
                prep["g2"], prep["be2"],
                prep["w1"], prep["b1"], prep["w2"], prep["b2"],
                prep["g3"], prep["be3"])

    mm2 = lambda m, k, n: 2 * m * k * n
    flops = (mm2(B * L, H, 3 * H)
             + B * head_n * (mm2(L, head_dim, L) + mm2(L, L, head_dim) + mm2(L, head_dim, H))
             + mm2(B * S, H, 2 * H)
             + B * head_n * (mm2(L, head_dim, S) + mm2(L, S, head_dim) + mm2(L, head_dim, H))
             + mm2(B * L, H, F) + mm2(B * L, F, H))
    transcendentals = B * head_n * (L * L + L * S) + 2 * B * head_n * L + 3 * B * L
    bytes_accessed = (sum(int(a.size) * a.dtype.itemsize for a in operands)
                      + B * L * H * query.dtype.itemsize)

    kernel = functools.partial(_decoder_layer_kernel, head_n=head_n, head_dim=head_dim,
                               inv_scale=inv_scale, eps=eps)

    # Single invocation (no grid): every operand is a whole-array VMEM block.  All tiles
    # are KB-sized, so VMEM is a non-issue on v5e/v6e (128 MiB) and v7x (64 MiB).
    return pl.pallas_call(
        kernel,
        out_shape=jax.ShapeDtypeStruct((B, L, H), query.dtype),
        cost_estimate=pl.CostEstimate(flops=int(flops),
                                      transcendentals=int(transcendentals),
                                      bytes_accessed=int(bytes_accessed)),
    )(*operands)


# ----------------------------- reference (pure JAX, f32) -------------------------------

def reference_decoder_layer(p, query, key, *, head_n, eps=1e-5):
    hidden = p["wo1"].shape[0]
    head_dim = hidden // head_n
    scale = float(head_dim) ** 0.5

    def mha(q_in, k_in, v_in, wq, bq, wk, bk, wv, bv, wo, bo):
        B, Lq, _ = q_in.shape
        Lk = k_in.shape[1]
        Q = q_in if wq is None else q_in @ wq.T + bq
        K = k_in @ wk.T + bk
        V = v_in @ wv.T + bv
        Q = Q.reshape(B, Lq, head_n, head_dim).transpose(0, 2, 1, 3)
        K = K.reshape(B, Lk, head_n, head_dim).transpose(0, 2, 1, 3)
        V = V.reshape(B, Lk, head_n, head_dim).transpose(0, 2, 1, 3)
        e = jnp.einsum("bhqd,bhkd->bhqk", Q, K) / scale
        a = jax.nn.softmax(e, axis=-1)
        x = jnp.einsum("bhqk,bhkd->bhqd", a, V)
        x = x.transpose(0, 2, 1, 3).reshape(B, Lq, hidden)
        return x @ wo.T + bo

    def ln(x, g, b):
        mu = x.mean(-1, keepdims=True)
        var = ((x - mu) ** 2).mean(-1, keepdims=True)
        return (x - mu) / jnp.sqrt(var + eps) * g + b

    first = mha(query, query, query, p["wq1"], p["bq1"], p["wk1"], p["bk1"],
                p["wv1"], p["bv1"], p["wo1"], p["bo1"])
    target = ln(query + first, p["g1"], p["be1"])
    second = mha(target, key, key, None, None, p["wk2"], p["bk2"],
                 p["wv2"], p["bv2"], p["wo2"], p["bo2"])
    target = ln(target + second, p["g2"], p["be2"])
    ffn = jnp.maximum(target @ p["w_fc1"].T + p["b_fc1"], 0.0) @ p["w_fc2"].T + p["b_fc2"]
    target = ln(target + ffn, p["g3"], p["be3"])
    return target


# ----------------------------- main -----------------------------------------------------

if __name__ == "__main__":
    # Small shapes consistent with the module: hidden % head_n == 0.
    B, L, S = 2, 8, 16                 # batch, decoder length, encoder (h/4*w/4) length
    hidden, head_n, ff = 32, 4, 64     # head_dim = 8

    keys = iter(jax.random.split(jax.random.PRNGKey(0), 32))

    def lin(out_d, in_d):
        w = 0.05 * jax.random.normal(next(keys), (out_d, in_d), jnp.float32)
        b = 0.05 * jax.random.normal(next(keys), (out_d,), jnp.float32)
        return w, b

    def ln_params():
        g = 1.0 + 0.1 * jax.random.normal(next(keys), (hidden,), jnp.float32)
        b = 0.1 * jax.random.normal(next(keys), (hidden,), jnp.float32)
        return g, b

    wq1, bq1 = lin(hidden, hidden); wk1, bk1 = lin(hidden, hidden)
    wv1, bv1 = lin(hidden, hidden); wo1, bo1 = lin(hidden, hidden)
    wk2, bk2 = lin(hidden, hidden); wv2, bv2 = lin(hidden, hidden)
    wo2, bo2 = lin(hidden, hidden)
    w_fc1, b_fc1 = lin(ff, hidden); w_fc2, b_fc2 = lin(hidden, ff)
    g1, be1 = ln_params(); g2, be2 = ln_params(); g3, be3 = ln_params()

    params = dict(wq1=wq1, bq1=bq1, wk1=wk1, bk1=bk1, wv1=wv1, bv1=bv1, wo1=wo1, bo1=bo1,
                  g1=g1, be1=be1,
                  wk2=wk2, bk2=bk2, wv2=wv2, bv2=bv2, wo2=wo2, bo2=bo2,
                  g2=g2, be2=be2,
                  w_fc1=w_fc1, b_fc1=b_fc1, w_fc2=w_fc2, b_fc2=b_fc2,
                  g3=g3, be3=be3)

    query = jax.random.normal(next(keys), (B, L, hidden), jnp.float32)
    key = jax.random.normal(next(keys), (B, S, hidden), jnp.float32)

    prepared = prepare_decoder_layer_params(params)     # one-time layout/bf16 prep
    out = decoder_layer_forward(prepared, query, key, head_n=head_n)
    out = jax.block_until_ready(out)

    ref = reference_decoder_layer(params, query, key, head_n=head_n)
    assert out.shape == (B, L, hidden)
    # Tolerance accounts for bf16 MXU operands (per review) + EUP approx reciprocal.
    assert jnp.allclose(out, ref, atol=3e-2, rtol=3e-2), (
        "mismatch vs reference; max abs diff = %s" % float(jnp.max(jnp.abs(out - ref))))

    print("KERNEL_OK")
</pallas_src>

<mosaic_0001>
module attributes {stable_mosaic.version = 11 : i64} {
  func.func @_decoder_layer_kernel(%arg0: memref<2x8x32xf32, #tpu.memory_space<vmem>>, %arg1: memref<2x16x32xf32, #tpu.memory_space<vmem>>, %arg2: memref<32x96xbf16, #tpu.memory_space<vmem>>, %arg3: memref<1x96xf32, #tpu.memory_space<vmem>>, %arg4: memref<32x32xbf16, #tpu.memory_space<vmem>>, %arg5: memref<1x32xf32, #tpu.memory_space<vmem>>, %arg6: memref<1x32xf32, #tpu.memory_space<vmem>>, %arg7: memref<1x32xf32, #tpu.memory_space<vmem>>, %arg8: memref<32x64xbf16, #tpu.memory_space<vmem>>, %arg9: memref<1x64xf32, #tpu.memory_space<vmem>>, %arg10: memref<32x32xbf16, #tpu.memory_space<vmem>>, %arg11: memref<1x32xf32, #tpu.memory_space<vmem>>, %arg12: memref<1x32xf32, #tpu.memory_space<vmem>>, %arg13: memref<1x32xf32, #tpu.memory_space<vmem>>, %arg14: memref<32x64xbf16, #tpu.memory_space<vmem>>, %arg15: memref<1x64xf32, #tpu.memory_space<vmem>>, %arg16: memref<64x32xbf16, #tpu.memory_space<vmem>>, %arg17: memref<1x32xf32, #tpu.memory_space<vmem>>, %arg18: memref<1x32xf32, #tpu.memory_space<vmem>>, %arg19: memref<1x32xf32, #tpu.memory_space<vmem>>, %arg20: memref<2x8x32xf32, #tpu.memory_space<vmem>>) attributes {dimension_semantics = [], scalar_prefetch = 0 : i64, scratch_operands = 0 : i64, tpu.core_type = #tpu.core_type<tc>} {
    %c0 = arith.constant 0 : index
    %c0_0 = arith.constant 0 : index
    %c0_1 = arith.constant 0 : index
    %0 = vector.load %arg0[%c0, %c0_0, %c0_1] : memref<2x8x32xf32, #tpu.memory_space<vmem>>, vector<2x8x32xf32>
    %1 = vector.shape_cast %0 : vector<2x8x32xf32> to vector<16x32xf32>
    %c0_2 = arith.constant 0 : index
    %c0_3 = arith.constant 0 : index
    %c0_4 = arith.constant 0 : index
    %2 = vector.load %arg1[%c0_2, %c0_3, %c0_4] : memref<2x16x32xf32, #tpu.memory_space<vmem>>, vector<2x16x32xf32>
    %3 = vector.shape_cast %2 : vector<2x16x32xf32> to vector<32x32xf32>
    %c0_5 = arith.constant 0 : index
    %c0_6 = arith.constant 0 : index
    %4 = vector.load %arg2[%c0_5, %c0_6] : memref<32x96xbf16, #tpu.memory_space<vmem>>, vector<32x96xbf16>
    %5 = arith.truncf %1 : vector<16x32xf32> to vector<16x32xbf16>
    %cst = arith.constant dense<0.000000e+00> : vector<16x96xf32>
    %6 = tpu.matmul %5, %4, %cst {dimension_numbers = #tpu.dot_dimension_numbers<[1], [0], [0], [1], [0, 0, 1, 1], [], []>} : vector<16x32xbf16>, vector<32x96xbf16>, vector<16x96xf32> -> vector<16x96xf32>
    %c0_7 = arith.constant 0 : index
    %c0_8 = arith.constant 0 : index
    %7 = vector.load %arg3[%c0_7, %c0_8] : memref<1x96xf32, #tpu.memory_space<vmem>>, vector<1x96xf32>
    %8 = vector.broadcast %7 : vector<1x96xf32> to vector<16x96xf32>
    %9 = arith.addf %6, %8 : vector<16x96xf32>
    %c0_9 = arith.constant 0 : index
    %c0_10 = arith.constant 0 : index
    %10 = vector.load %arg4[%c0_9, %c0_10] : memref<32x32xbf16, #tpu.memory_space<vmem>>, vector<32x32xbf16>
    %11 = vector.extract_strided_slice %9 {offsets = [0, 0], sizes = [8, 32], strides = [1, 1]} : vector<16x96xf32> to vector<8x32xf32>
    %cst_11 = arith.constant 0.353553385 : f32
    %12 = vector.broadcast %cst_11 : f32 to vector<8x32xf32>
    %13 = arith.mulf %11, %12 : vector<8x32xf32>
    %14 = vector.extract_strided_slice %9 {offsets = [0, 32], sizes = [8, 32], strides = [1, 1]} : vector<16x96xf32> to vector<8x32xf32>
    %15 = vector.extract_strided_slice %9 {offsets = [0, 64], sizes = [8, 32], strides = [1, 1]} : vector<16x96xf32> to vector<8x32xf32>
    %16 = vector.extract_strided_slice %13 {offsets = [0, 0], sizes = [8, 8], strides = [1, 1]} : vector<8x32xf32> to vector<8x8xf32>
    %17 = arith.truncf %16 : vector<8x8xf32> to vector<8x8xbf16>
    %18 = vector.extract_strided_slice %14 {offsets = [0, 0], sizes = [8, 8], strides = [1, 1]} : vector<8x32xf32> to vector<8x8xf32>
    %19 = arith.truncf %18 : vector<8x8xf32> to vector<8x8xbf16>
    %20 = vector.extract_strided_slice %15 {offsets = [0, 0], sizes = [8, 8], strides = [1, 1]} : vector<8x32xf32> to vector<8x8xf32>
    %21 = arith.truncf %20 : vector<8x8xf32> to vector<8x8xbf16>
    %cst_12 = arith.constant dense<0.000000e+00> : vector<8x8xf32>
    %22 = tpu.matmul %17, %19, %cst_12 {dimension_numbers = #tpu.dot_dimension_numbers<[1], [1], [0], [0], [0, 0, 1, 0], [], []>} : vector<8x8xbf16>, vector<8x8xbf16>, vector<8x8xf32> -> vector<8x8xf32>
    %cst_13 = arith.constant dense<0xFF800000> : vector<8xf32>
    %23 = vector.multi_reduction <maximumf>, %22, %cst_13 [1] : vector<8x8xf32> to vector<8xf32>
    %24 = vector.shape_cast %23 : vector<8xf32> to vector<8x1xf32>
    %25 = vector.broadcast %24 : vector<8x1xf32> to vector<8x8xf32>
    %26 = arith.subf %22, %25 : vector<8x8xf32>
    %27 = math.exp %26 : vector<8x8xf32>
    %cst_14 = arith.constant dense<0.000000e+00> : vector<8xf32>
    %28 = vector.multi_reduction <add>, %27, %cst_14 [1] : vector<8x8xf32> to vector<8xf32>
    %29 = vector.shape_cast %28 : vector<8xf32> to vector<8x1xf32>
    %30 = tpu.reciprocal %29 {approx = true} : vector<8x1xf32> -> vector<8x1xf32>
    %31 = vector.broadcast %30 : vector<8x1xf32> to vector<8x8xf32>
    %32 = arith.mulf %27, %31 : vector<8x8xf32>
    %33 = arith.truncf %32 : vector<8x8xf32> to vector<8x8xbf16>
    %cst_15 = arith.constant dense<0.000000e+00> : vector<8x8xf32>
    %34 = tpu.matmul %33, %21, %cst_15 {dimension_numbers = #tpu.dot_dimension_numbers<[1], [0], [0], [1], [0, 0, 1, 1], [], []>} : vector<8x8xbf16>, vector<8x8xbf16>, vector<8x8xf32> -> vector<8x8xf32>
    %35 = arith.truncf %34 : vector<8x8xf32> to vector<8x8xbf16>
    %36 = vector.extract_strided_slice %10 {offsets = [0, 0], sizes = [8, 32], strides = [1, 1]} : vector<32x32xbf16> to vector<8x32xbf16>
    %cst_16 = arith.constant dense<0.000000e+00> : vector<8x32xf32>
    %37 = tpu.matmul %35, %36, %cst_16 {dimension_numbers = #tpu.dot_dimension_numbers<[1], [0], [0], [1], [0, 0, 1, 1], [], []>} : vector<8x8xbf16>, vector<8x32xbf16>, vector<8x32xf32> -> vector<8x32xf32>
    %38 = vector.extract_strided_slice %13 {offsets = [0, 8], sizes = [8, 8], strides = [1, 1]} : vector<8x32xf32> to vector<8x8xf32>
    %39 = arith.truncf %38 : vector<8x8xf32> to vector<8x8xbf16>
    %40 = vector.extract_strided_slice %14 {offsets = [0, 8], sizes = [8, 8], strides = [1, 1]} : vector<8x32xf32> to vector<8x8xf32>
    %41 = arith.truncf %40 : vector<8x8xf32> to vector<8x8xbf16>
    %42 = vector.extract_strided_slice %15 {offsets = [0, 8], sizes = [8, 8], strides = [1, 1]} : vector<8x32xf32> to vector<8x8xf32>
    %43 = arith.truncf %42 : vector<8x8xf32> to vector<8x8xbf16>
    %cst_17 = arith.constant dense<0.000000e+00> : vector<8x8xf32>
    %44 = tpu.matmul %39, %41, %cst_17 {dimension_numbers = #tpu.dot_dimension_numbers<[1], [1], [0], [0], [0, 0, 1, 0], [], []>} : vector<8x8xbf16>, vector<8x8xbf16>, vector<8x8xf32> -> vector<8x8xf32>
    %cst_18 = arith.constant dense<0xFF800000> : vector<8xf32>
    %45 = vector.multi_reduction <maximumf>, %44, %cst_18 [1] : vector<8x8xf32> to vector<8xf32>
    %46 = vector.shape_cast %45 : vector<8xf32> to vector<8x1xf32>
    %47 = vector.broadcast %46 : vector<8x1xf32> to vector<8x8xf32>
    %48 = arith.subf %44, %47 : vector<8x8xf32>
    %49 = math.exp %48 : vector<8x8xf32>
    %cst_19 = arith.constant dense<0.000000e+00> : vector<8xf32>
    %50 = vector.multi_reduction <add>, %49, %cst_19 [1] : vector<8x8xf32> to vector<8xf32>
    %51 = vector.shape_cast %50 : vector<8xf32> to vector<8x1xf32>
    %52 = tpu.reciprocal %51 {approx = true} : vector<8x1xf32> -> vector<8x1xf32>
    %53 = vector.broadcast %52 : vector<8x1xf32> to vector<8x8xf32>
    %54 = arith.mulf %49, %53 : vector<8x8xf32>
    %55 = arith.truncf %54 : vector<8x8xf32> to vector<8x8xbf16>
    %cst_20 = arith.constant dense<0.000000e+00> : vector<8x8xf32>
    %56 = tpu.matmul %55, %43, %cst_20 {dimension_numbers = #tpu.dot_dimension_numbers<[1], [0], [0], [1], [0, 0, 1, 1], [], []>} : vector<8x8xbf16>, vector<8x8xbf16>, vector<8x8xf32> -> vector<8x8xf32>
    %57 = arith.truncf %56 : vector<8x8xf32> to vector<8x8xbf16>
    %58 = vector.extract_strided_slice %10 {offsets = [8, 0], sizes = [8, 32], strides = [1, 1]} : vector<32x32xbf16> to vector<8x32xbf16>
    %cst_21 = arith.constant dense<0.000000e+00> : vector<8x32xf32>
    %59 = tpu.matmul %57, %58, %cst_21 {dimension_numbers = #tpu.dot_dimension_numbers<[1], [0], [0], [1], [0, 0, 1, 1], [], []>} : vector<8x8xbf16>, vector<8x32xbf16>, vector<8x32xf32> -> vector<8x32xf32>
    %60 = vector.extract_strided_slice %13 {offsets = [0, 16], sizes = [8, 8], strides = [1, 1]} : vector<8x32xf32> to vector<8x8xf32>
    %61 = arith.truncf %60 : vector<8x8xf32> to vector<8x8xbf16>
    %62 = vector.extract_strided_slice %14 {offsets = [0, 16], sizes = [8, 8], strides = [1, 1]} : vector<8x32xf32> to vector<8x8xf32>
    %63 = arith.truncf %62 : vector<8x8xf32> to vector<8x8xbf16>
    %64 = vector.extract_strided_slice %15 {offsets = [0, 16], sizes = [8, 8], strides = [1, 1]} : vector<8x32xf32> to vector<8x8xf32>
    %65 = arith.truncf %64 : vector<8x8xf32> to vector<8x8xbf16>
    %cst_22 = arith.constant dense<0.000000e+00> : vector<8x8xf32>
    %66 = tpu.matmul %61, %63, %cst_22 {dimension_numbers = #tpu.dot_dimension_numbers<[1], [1], [0], [0], [0, 0, 1, 0], [], []>} : vector<8x8xbf16>, vector<8x8xbf16>, vector<8x8xf32> -> vector<8x8xf32>
    %cst_23 = arith.constant dense<0xFF800000> : vector<8xf32>
    %67 = vector.multi_reduction <maximumf>, %66, %cst_23 [1] : vector<8x8xf32> to vector<8xf32>
    %68 = vector.shape_cast %67 : vector<8xf32> to vector<8x1xf32>
    %69 = vector.broadcast %68 : vector<8x1xf32> to vector<8x8xf32>
    %70 = arith.subf %66, %69 : vector<8x8xf32>
    %71 = math.exp %70 : vector<8x8xf32>
    %cst_24 = arith.constant dense<0.000000e+00> : vector<8xf32>
    %72 = vector.multi_reduction <add>, %71, %cst_24 [1] : vector<8x8xf32> to vector<8xf32>
    %73 = vector.shape_cast %72 : vector<8xf32> to vector<8x1xf32>
    %74 = tpu.reciprocal %73 {approx = true} : vector<8x1xf32> -> vector<8x1xf32>
    %75 = vector.broadcast %74 : vector<8x1xf32> to vector<8x8xf32>
    %76 = arith.mulf %71, %75 : vector<8x8xf32>
    %77 = arith.truncf %76 : vector<8x8xf32> to vector<8x8xbf16>
    %cst_25 = arith.constant dense<0.000000e+00> : vector<8x8xf32>
    %78 = tpu.matmul %77, %65, %cst_25 {dimension_numbers = #tpu.dot_dimension_numbers<[1], [0], [0], [1], [0, 0, 1, 1], [], []>} : vector<8x8xbf16>, vector<8x8xbf16>, vector<8x8xf32> -> vector<8x8xf32>
    %79 = arith.truncf %78 : vector<8x8xf32> to vector<8x8xbf16>
    %80 = vector.extract_strided_slice %10 {offsets = [16, 0], sizes = [8, 32], strides = [1, 1]} : vector<32x32xbf16> to vector<8x32xbf16>
    %cst_26 = arith.constant dense<0.000000e+00> : vector<8x32xf32>
    %81 = tpu.matmul %79, %80, %cst_26 {dimension_numbers = #tpu.dot_dimension_numbers<[1], [0], [0], [1], [0, 0, 1, 1], [], []>} : vector<8x8xbf16>, vector<8x32xbf16>, vector<8x32xf32> -> vector<8x32xf32>
    %82 = vector.extract_strided_slice %13 {offsets = [0, 24], sizes = [8, 8], strides = [1, 1]} : vector<8x32xf32> to vector<8x8xf32>
    %83 = arith.truncf %82 : vector<8x8xf32> to vector<8x8xbf16>
    %84 = vector.extract_strided_slice %14 {offsets = [0, 24], sizes = [8, 8], strides = [1, 1]} : vector<8x32xf32> to vector<8x8xf32>
    %85 = arith.truncf %84 : vector<8x8xf32> to vector<8x8xbf16>
    %86 = vector.extract_strided_slice %15 {offsets = [0, 24], sizes = [8, 8], strides = [1, 1]} : vector<8x32xf32> to vector<8x8xf32>
    %87 = arith.truncf %86 : vector<8x8xf32> to vector<8x8xbf16>
    %cst_27 = arith.constant dense<0.000000e+00> : vector<8x8xf32>
    %88 = tpu.matmul %83, %85, %cst_27 {dimension_numbers = #tpu.dot_dimension_numbers<[1], [1], [0], [0], [0, 0, 1, 0], [], []>} : vector<8x8xbf16>, vector<8x8xbf16>, vector<8x8xf32> -> vector<8x8xf32>
    %cst_28 = arith.constant dense<0xFF800000> : vector<8xf32>
    %89 = vector.multi_reduction <maximumf>, %88, %cst_28 [1] : vector<8x8xf32> to vector<8xf32>
    %90 = vector.shape_cast %89 : vector<8xf32> to vector<8x1xf32>
    %91 = vector.broadcast %90 : vector<8x1xf32> to vector<8x8xf32>
    %92 = arith.subf %88, %91 : vector<8x8xf32>
    %93 = math.exp %92 : vector<8x8xf32>
    %cst_29 = arith.constant dense<0.000000e+00> : vector<8xf32>
    %94 = vector.multi_reduction <add>, %93, %cst_29 [1] : vector<8x8xf32> to vector<8xf32>
    %95 = vector.shape_cast %94 : vector<8xf32> to vector<8x1xf32>
    %96 = tpu.reciprocal %95 {approx = true} : vector<8x1xf32> -> vector<8x1xf32>
    %97 = vector.broadcast %96 : vector<8x1xf32> to vector<8x8xf32>
    %98 = arith.mulf %93, %97 : vector<8x8xf32>
    %99 = arith.truncf %98 : vector<8x8xf32> to vector<8x8xbf16>
    %cst_30 = arith.constant dense<0.000000e+00> : vector<8x8xf32>
    %100 = tpu.matmul %99, %87, %cst_30 {dimension_numbers = #tpu.dot_dimension_numbers<[1], [0], [0], [1], [0, 0, 1, 1], [], []>} : vector<8x8xbf16>, vector<8x8xbf16>, vector<8x8xf32> -> vector<8x8xf32>
    %101 = arith.truncf %100 : vector<8x8xf32> to vector<8x8xbf16>
    %102 = vector.extract_strided_slice %10 {offsets = [24, 0], sizes = [8, 32], strides = [1, 1]} : vector<32x32xbf16> to vector<8x32xbf16>
    %cst_31 = arith.constant dense<0.000000e+00> : vector<8x32xf32>
    %103 = tpu.matmul %101, %102, %cst_31 {dimension_numbers = #tpu.dot_dimension_numbers<[1], [0], [0], [1], [0, 0, 1, 1], [], []>} : vector<8x8xbf16>, vector<8x32xbf16>, vector<8x32xf32> -> vector<8x32xf32>
    %104 = arith.addf %37, %59 : vector<8x32xf32>
    %105 = arith.addf %81, %103 : vector<8x32xf32>
    %106 = arith.addf %104, %105 : vector<8x32xf32>
    %c0_32 = arith.constant 0 : index
    %c0_33 = arith.constant 0 : index
    %107 = vector.load %arg5[%c0_32, %c0_33] : memref<1x32xf32, #tpu.memory_space<vmem>>, vector<1x32xf32>
    %108 = vector.broadcast %107 : vector<1x32xf32> to vector<8x32xf32>
    %109 = arith.addf %106, %108 : vector<8x32xf32>
    %110 = vector.extract_strided_slice %9 {offsets = [8, 0], sizes = [8, 32], strides = [1, 1]} : vector<16x96xf32> to vector<8x32xf32>
    %cst_34 = arith.constant 0.353553385 : f32
    %111 = vector.broadcast %cst_34 : f32 to vector<8x32xf32>
    %112 = arith.mulf %110, %111 : vector<8x32xf32>
    %113 = vector.extract_strided_slice %9 {offsets = [8, 32], sizes = [8, 32], strides = [1, 1]} : vector<16x96xf32> to vector<8x32xf32>
    %114 = vector.extract_strided_slice %9 {offsets = [8, 64], sizes = [8, 32], strides = [1, 1]} : vector<16x96xf32> to vector<8x32xf32>
    %115 = vector.extract_strided_slice %112 {offsets = [0, 0], sizes = [8, 8], strides = [1, 1]} : vector<8x32xf32> to vector<8x8xf32>
    %116 = arith.truncf %115 : vector<8x8xf32> to vector<8x8xbf16>
    %117 = vector.extract_strided_slice %113 {offsets = [0, 0], sizes = [8, 8], strides = [1, 1]} : vector<8x32xf32> to vector<8x8xf32>
    %118 = arith.truncf %117 : vector<8x8xf32> to vector<8x8xbf16>
    %119 = vector.extract_strided_slice %114 {offsets = [0, 0], sizes = [8, 8], strides = [1, 1]} : vector<8x32xf32> to vector<8x8xf32>
    %120 = arith.truncf %119 : vector<8x8xf32> to vector<8x8xbf16>
    %cst_35 = arith.constant dense<0.000000e+00> : vector<8x8xf32>
    %121 = tpu.matmul %116, %118, %cst_35 {dimension_numbers = #tpu.dot_dimension_numbers<[1], [1], [0], [0], [0, 0, 1, 0], [], []>} : vector<8x8xbf16>, vector<8x8xbf16>, vector<8x8xf32> -> vector<8x8xf32>
    %cst_36 = arith.constant dense<0xFF800000> : vector<8xf32>
    %122 = vector.multi_reduction <maximumf>, %121, %cst_36 [1] : vector<8x8xf32> to vector<8xf32>
    %123 = vector.shape_cast %122 : vector<8xf32> to vector<8x1xf32>
    %124 = vector.broadcast %123 : vector<8x1xf32> to vector<8x8xf32>
    %125 = arith.subf %121, %124 : vector<8x8xf32>
    %126 = math.exp %125 : vector<8x8xf32>
    %cst_37 = arith.constant dense<0.000000e+00> : vector<8xf32>
    %127 = vector.multi_reduction <add>, %126, %cst_37 [1] : vector<8x8xf32> to vector<8xf32>
    %128 = vector.shape_cast %127 : vector<8xf32> to vector<8x1xf32>
    %129 = tpu.reciprocal %128 {approx = true} : vector<8x1xf32> -> vector<8x1xf32>
    %130 = vector.broadcast %129 : vector<8x1xf32> to vector<8x8xf32>
    %131 = arith.mulf %126, %130 : vector<8x8xf32>
    %132 = arith.truncf %131 : vector<8x8xf32> to vector<8x8xbf16>
    %cst_38 = arith.constant dense<0.000000e+00> : vector<8x8xf32>
    %133 = tpu.matmul %132, %120, %cst_38 {dimension_numbers = #tpu.dot_dimension_numbers<[1], [0], [0], [1], [0, 0, 1, 1], [], []>} : vector<8x8xbf16>, vector<8x8xbf16>, vector<8x8xf32> -> vector<8x8xf32>
    %134 = arith.truncf %133 : vector<8x8xf32> to vector<8x8xbf16>
    %135 = vector.extract_strided_slice %10 {offsets = [0, 0], sizes = [8, 32], strides = [1, 1]} : vector<32x32xbf16> to vector<8x32xbf16>
    %cst_39 = arith.constant dense<0.000000e+00> : vector<8x32xf32>
    %136 = tpu.matmul %134, %135, %cst_39 {dimension_numbers = #tpu.dot_dimension_numbers<[1], [0], [0], [1], [0, 0, 1, 1], [], []>} : vector<8x8xbf16>, vector<8x32xbf16>, vector<8x32xf32> -> vector<8x32xf32>
    %137 = vector.extract_strided_slice %112 {offsets = [0, 8], sizes = [8, 8], strides = [1, 1]} : vector<8x32xf32> to vector<8x8xf32>
    %138 = arith.truncf %137 : vector<8x8xf32> to vector<8x8xbf16>
    %139 = vector.extract_strided_slice %113 {offsets = [0, 8], sizes = [8, 8], strides = [1, 1]} : vector<8x32xf32> to vector<8x8xf32>
    %140 = arith.truncf %139 : vector<8x8xf32> to vector<8x8xbf16>
    %141 = vector.extract_strided_slice %114 {offsets = [0, 8], sizes = [8, 8], strides = [1, 1]} : vector<8x32xf32> to vector<8x8xf32>
    %142 = arith.truncf %141 : vector<8x8xf32> to vector<8x8xbf16>
    %cst_40 = arith.constant dense<0.000000e+00> : vector<8x8xf32>
    %143 = tpu.matmul %138, %140, %cst_40 {dimension_numbers = #tpu.dot_dimension_numbers<[1], [1], [0], [0], [0, 0, 1, 0], [], []>} : vector<8x8xbf16>, vector<8x8xbf16>, vector<8x8xf32> -> vector<8x8xf32>
    %cst_41 = arith.constant dense<0xFF800000> : vector<8xf32>
    %144 = vector.multi_reduction <maximumf>, %143, %cst_41 [1] : vector<8x8xf32> to vector<8xf32>
    %145 = vector.shape_cast %144 : vector<8xf32> to vector<8x1xf32>
    %146 = vector.broadcast %145 : vector<8x1xf32> to vector<8x8xf32>
    %147 = arith.subf %143, %146 : vector<8x8xf32>
    %148 = math.exp %147 : vector<8x8xf32>
    %cst_42 = arith.constant dense<0.000000e+00> : vector<8xf32>
    %149 = vector.multi_reduction <add>, %148, %cst_42 [1] : vector<8x8xf32> to vector<8xf32>
    %150 = vector.shape_cast %149 : vector<8xf32> to vector<8x1xf32>
    %151 = tpu.reciprocal %150 {approx = true} : vector<8x1xf32> -> vector<8x1xf32>
    %152 = vector.broadcast %151 : vector<8x1xf32> to vector<8x8xf32>
    %153 = arith.mulf %148, %152 : vector<8x8xf32>
    %154 = arith.truncf %153 : vector<8x8xf32> to vector<8x8xbf16>
    %cst_43 = arith.constant dense<0.000000e+00> : vector<8x8xf32>
    %155 = tpu.matmul %154, %142, %cst_43 {dimension_numbers = #tpu.dot_dimension_numbers<[1], [0], [0], [1], [0, 0, 1, 1], [], []>} : vector<8x8xbf16>, vector<8x8xbf16>, vector<8x8xf32> -> vector<8x8xf32>
    %156 = arith.truncf %155 : vector<8x8xf32> to vector<8x8xbf16>
    %157 = vector.extract_strided_slice %10 {offsets = [8, 0], sizes = [8, 32], strides = [1, 1]} : vector<32x32xbf16> to vector<8x32xbf16>
    %cst_44 = arith.constant dense<0.000000e+00> : vector<8x32xf32>
    %158 = tpu.matmul %156, %157, %cst_44 {dimension_numbers = #tpu.dot_dimension_numbers<[1], [0], [0], [1], [0, 0, 1, 1], [], []>} : vector<8x8xbf16>, vector<8x32xbf16>, vector<8x32xf32> -> vector<8x32xf32>
    %159 = vector.extract_strided_slice %112 {offsets = [0, 16], sizes = [8, 8], strides = [1, 1]} : vector<8x32xf32> to vector<8x8xf32>
    %160 = arith.truncf %159 : vector<8x8xf32> to vector<8x8xbf16>
    %161 = vector.extract_strided_slice %113 {offsets = [0, 16], sizes = [8, 8], strides = [1, 1]} : vector<8x32xf32> to vector<8x8xf32>
    %162 = arith.truncf %161 : vector<8x8xf32> to vector<8x8xbf16>
    %163 = vector.extract_strided_slice %114 {offsets = [0, 16], sizes = [8, 8], strides = [1, 1]} : vector<8x32xf32> to vector<8x8xf32>
    %164 = arith.truncf %163 : vector<8x8xf32> to vector<8x8xbf16>
    %cst_45 = arith.constant dense<0.000000e+00> : vector<8x8xf32>
    %165 = tpu.matmul %160, %162, %cst_45 {dimension_numbers = #tpu.dot_dimension_numbers<[1], [1], [0], [0], [0, 0, 1, 0], [], []>} : vector<8x8xbf16>, vector<8x8xbf16>, vector<8x8xf32> -> vector<8x8xf32>
    %cst_46 = arith.constant dense<0xFF800000> : vector<8xf32>
    %166 = vector.multi_reduction <maximumf>, %165, %cst_46 [1] : vector<8x8xf32> to vector<8xf32>
    %167 = vector.shape_cast %166 : vector<8xf32> to vector<8x1xf32>
    %168 = vector.broadcast %167 : vector<8x1xf32> to vector<8x8xf32>
    %169 = arith.subf %165, %168 : vector<8x8xf32>
    %170 = math.exp %169 : vector<8x8xf32>
    %cst_47 = arith.constant dense<0.000000e+00> : vector<8xf32>
    %171 = vector.multi_reduction <add>, %170, %cst_47 [1] : vector<8x8xf32> to vector<8xf32>
    %172 = vector.shape_cast %171 : vector<8xf32> to vector<8x1xf32>
    %173 = tpu.reciprocal %172 {approx = true} : vector<8x1xf32> -> vector<8x1xf32>
    %174 = vector.broadcast %173 : vector<8x1xf32> to vector<8x8xf32>
    %175 = arith.mulf %170, %174 : vector<8x8xf32>
    %176 = arith.truncf %175 : vector<8x8xf32> to vector<8x8xbf16>
    %cst_48 = arith.constant dense<0.000000e+00> : vector<8x8xf32>
    %177 = tpu.matmul %176, %164, %cst_48 {dimension_numbers = #tpu.dot_dimension_numbers<[1], [0], [0], [1], [0, 0, 1, 1], [], []>} : vector<8x8xbf16>, vector<8x8xbf16>, vector<8x8xf32> -> vector<8x8xf32>
    %178 = arith.truncf %177 : vector<8x8xf32> to vector<8x8xbf16>
    %179 = vector.extract_strided_slice %10 {offsets = [16, 0], sizes = [8, 32], strides = [1, 1]} : vector<32x32xbf16> to vector<8x32xbf16>
    %cst_49 = arith.constant dense<0.000000e+00> : vector<8x32xf32>
    %180 = tpu.matmul %178, %179, %cst_49 {dimension_numbers = #tpu.dot_dimension_numbers<[1], [0], [0], [1], [0, 0, 1, 1], [], []>} : vector<8x8xbf16>, vector<8x32xbf16>, vector<8x32xf32> -> vector<8x32xf32>
    %181 = vector.extract_strided_slice %112 {offsets = [0, 24], sizes = [8, 8], strides = [1, 1]} : vector<8x32xf32> to vector<8x8xf32>
    %182 = arith.truncf %181 : vector<8x8xf32> to vector<8x8xbf16>
    %183 = vector.extract_strided_slice %113 {offsets = [0, 24], sizes = [8, 8], strides = [1, 1]} : vector<8x32xf32> to vector<8x8xf32>
    %184 = arith.truncf %183 : vector<8x8xf32> to vector<8x8xbf16>
    %185 = vector.extract_strided_slice %114 {offsets = [0, 24], sizes = [8, 8], strides = [1, 1]} : vector<8x32xf32> to vector<8x8xf32>
    %186 = arith.truncf %185 : vector<8x8xf32> to vector<8x8xbf16>
    %cst_50 = arith.constant dense<0.000000e+00> : vector<8x8xf32>
    %187 = tpu.matmul %182, %184, %cst_50 {dimension_numbers = #tpu.dot_dimension_numbers<[1], [1], [0], [0], [0, 0, 1, 0], [], []>} : vector<8x8xbf16>, vector<8x8xbf16>, vector<8x8xf32> -> vector<8x8xf32>
    %cst_51 = arith.constant dense<0xFF800000> : vector<8xf32>
    %188 = vector.multi_reduction <maximumf>, %187, %cst_51 [1] : vector<8x8xf32> to vector<8xf32>
    %189 = vector.shape_cast %188 : vector<8xf32> to vector<8x1xf32>
    %190 = vector.broadcast %189 : vector<8x1xf32> to vector<8x8xf32>
    %191 = arith.subf %187, %190 : vector<8x8xf32>
    %192 = math.exp %191 : vector<8x8xf32>
    %cst_52 = arith.constant dense<0.000000e+00> : vector<8xf32>
    %193 = vector.multi_reduction <add>, %192, %cst_52 [1] : vector<8x8xf32> to vector<8xf32>
    %194 = vector.shape_cast %193 : vector<8xf32> to vector<8x1xf32>
    %195 = tpu.reciprocal %194 {approx = true} : vector<8x1xf32> -> vector<8x1xf32>
    %196 = vector.broadcast %195 : vector<8x1xf32> to vector<8x8xf32>
    %197 = arith.mulf %192, %196 : vector<8x8xf32>
    %198 = arith.truncf %197 : vector<8x8xf32> to vector<8x8xbf16>
    %cst_53 = arith.constant dense<0.000000e+00> : vector<8x8xf32>
    %199 = tpu.matmul %198, %186, %cst_53 {dimension_numbers = #tpu.dot_dimension_numbers<[1], [0], [0], [1], [0, 0, 1, 1], [], []>} : vector<8x8xbf16>, vector<8x8xbf16>, vector<8x8xf32> -> vector<8x8xf32>
    %200 = arith.truncf %199 : vector<8x8xf32> to vector<8x8xbf16>
    %201 = vector.extract_strided_slice %10 {offsets = [24, 0], sizes = [8, 32], strides = [1, 1]} : vector<32x32xbf16> to vector<8x32xbf16>
    %cst_54 = arith.constant dense<0.000000e+00> : vector<8x32xf32>
    %202 = tpu.matmul %200, %201, %cst_54 {dimension_numbers = #tpu.dot_dimension_numbers<[1], [0], [0], [1], [0, 0, 1, 1], [], []>} : vector<8x8xbf16>, vector<8x32xbf16>, vector<8x32xf32> -> vector<8x32xf32>
    %203 = arith.addf %136, %158 : vector<8x32xf32>
    %204 = arith.addf %180, %202 : vector<8x32xf32>
    %205 = arith.addf %203, %204 : vector<8x32xf32>
    %c0_55 = arith.constant 0 : index
    %c0_56 = arith.constant 0 : index
    %206 = vector.load %arg5[%c0_55, %c0_56] : memref<1x32xf32, #tpu.memory_space<vmem>>, vector<1x32xf32>
    %207 = vector.broadcast %206 : vector<1x32xf32> to vector<8x32xf32>
    %208 = arith.addf %205, %207 : vector<8x32xf32>
    %209 = tpu.concatenate %109, %208 in 0 : vector<8x32xf32>, vector<8x32xf32> -> vector<16x32xf32>
    %210 = arith.addf %1, %209 : vector<16x32xf32>
    %cst_57 = arith.constant dense<0.000000e+00> : vector<16xf32>
    %211 = vector.multi_reduction <add>, %210, %cst_57 [1] : vector<16x32xf32> to vector<16xf32>
    %212 = vector.shape_cast %211 : vector<16xf32> to vector<16x1xf32>
    %cst_58 = arith.constant 3.200000e+01 : f32
    %213 = vector.broadcast %cst_58 : f32 to vector<16x1xf32>
    %214 = arith.divf %212, %213 : vector<16x1xf32>
    %215 = vector.broadcast %214 : vector<16x1xf32> to vector<16x32xf32>
    %216 = arith.subf %210, %215 : vector<16x32xf32>
    %217 = arith.mulf %216, %216 : vector<16x32xf32>
    %cst_59 = arith.constant dense<0.000000e+00> : vector<16xf32>
    %218 = vector.multi_reduction <add>, %217, %cst_59 [1] : vector<16x32xf32> to vector<16xf32>
    %219 = vector.shape_cast %218 : vector<16xf32> to vector<16x1xf32>
    %cst_60 = arith.constant 3.200000e+01 : f32
    %220 = vector.broadcast %cst_60 : f32 to vector<16x1xf32>
    %221 = arith.divf %219, %220 : vector<16x1xf32>
    %cst_61 = arith.constant 9.99999974E-6 : f32
    %222 = vector.broadcast %cst_61 : f32 to vector<16x1xf32>
    %223 = arith.addf %221, %222 : vector<16x1xf32>
    %224 = math.rsqrt %223 : vector<16x1xf32>
    %225 = vector.broadcast %224 : vector<16x1xf32> to vector<16x32xf32>
    %226 = arith.mulf %216, %225 : vector<16x32xf32>
    %c0_62 = arith.constant 0 : index
    %c0_63 = arith.constant 0 : index
    %227 = vector.load %arg6[%c0_62, %c0_63] : memref<1x32xf32, #tpu.memory_space<vmem>>, vector<1x32xf32>
    %228 = vector.broadcast %227 : vector<1x32xf32> to vector<16x32xf32>
    %229 = arith.mulf %226, %228 : vector<16x32xf32>
    %c0_64 = arith.constant 0 : index
    %c0_65 = arith.constant 0 : index
    %230 = vector.load %arg7[%c0_64, %c0_65] : memref<1x32xf32, #tpu.memory_space<vmem>>, vector<1x32xf32>
    %231 = vector.broadcast %230 : vector<1x32xf32> to vector<16x32xf32>
    %232 = arith.addf %229, %231 : vector<16x32xf32>
    %c0_66 = arith.constant 0 : index
    %c0_67 = arith.constant 0 : index
    %233 = vector.load %arg8[%c0_66, %c0_67] : memref<32x64xbf16, #tpu.memory_space<vmem>>, vector<32x64xbf16>
    %234 = arith.truncf %3 : vector<32x32xf32> to vector<32x32xbf16>
    %cst_68 = arith.constant dense<0.000000e+00> : vector<32x64xf32>
    %235 = tpu.matmul %234, %233, %cst_68 {dimension_numbers = #tpu.dot_dimension_numbers<[1], [0], [0], [1], [0, 0, 1, 1], [], []>} : vector<32x32xbf16>, vector<32x64xbf16>, vector<32x64xf32> -> vector<32x64xf32>
    %c0_69 = arith.constant 0 : index
    %c0_70 = arith.constant 0 : index
    %236 = vector.load %arg9[%c0_69, %c0_70] : memref<1x64xf32, #tpu.memory_space<vmem>>, vector<1x64xf32>
    %237 = vector.broadcast %236 : vector<1x64xf32> to vector<32x64xf32>
    %238 = arith.addf %235, %237 : vector<32x64xf32>
    %c0_71 = arith.constant 0 : index
    %c0_72 = arith.constant 0 : index
    %239 = vector.load %arg10[%c0_71, %c0_72] : memref<32x32xbf16, #tpu.memory_space<vmem>>, vector<32x32xbf16>
    %240 = vector.extract_strided_slice %232 {offsets = [0, 0], sizes = [8, 32], strides = [1, 1]} : vector<16x32xf32> to vector<8x32xf32>
    %cst_73 = arith.constant 0.353553385 : f32
    %241 = vector.broadcast %cst_73 : f32 to vector<8x32xf32>
    %242 = arith.mulf %240, %241 : vector<8x32xf32>
    %243 = vector.extract_strided_slice %238 {offsets = [0, 0], sizes = [16, 32], strides = [1, 1]} : vector<32x64xf32> to vector<16x32xf32>
    %244 = vector.extract_strided_slice %238 {offsets = [0, 32], sizes = [16, 32], strides = [1, 1]} : vector<32x64xf32> to vector<16x32xf32>
    %245 = vector.extract_strided_slice %242 {offsets = [0, 0], sizes = [8, 8], strides = [1, 1]} : vector<8x32xf32> to vector<8x8xf32>
    %246 = arith.truncf %245 : vector<8x8xf32> to vector<8x8xbf16>
    %247 = vector.extract_strided_slice %243 {offsets = [0, 0], sizes = [16, 8], strides = [1, 1]} : vector<16x32xf32> to vector<16x8xf32>
    %248 = arith.truncf %247 : vector<16x8xf32> to vector<16x8xbf16>
    %249 = vector.extract_strided_slice %244 {offsets = [0, 0], sizes = [16, 8], strides = [1, 1]} : vector<16x32xf32> to vector<16x8xf32>
    %250 = arith.truncf %249 : vector<16x8xf32> to vector<16x8xbf16>
    %cst_74 = arith.constant dense<0.000000e+00> : vector<8x16xf32>
    %251 = tpu.matmul %246, %248, %cst_74 {dimension_numbers = #tpu.dot_dimension_numbers<[1], [1], [0], [0], [0, 0, 1, 0], [], []>} : vector<8x8xbf16>, vector<16x8xbf16>, vector<8x16xf32> -> vector<8x16xf32>
    %cst_75 = arith.constant dense<0xFF800000> : vector<8xf32>
    %252 = vector.multi_reduction <maximumf>, %251, %cst_75 [1] : vector<8x16xf32> to vector<8xf32>
    %253 = vector.shape_cast %252 : vector<8xf32> to vector<8x1xf32>
    %254 = vector.broadcast %253 : vector<8x1xf32> to vector<8x16xf32>
    %255 = arith.subf %251, %254 : vector<8x16xf32>
    %256 = math.exp %255 : vector<8x16xf32>
    %cst_76 = arith.constant dense<0.000000e+00> : vector<8xf32>
    %257 = vector.multi_reduction <add>, %256, %cst_76 [1] : vector<8x16xf32> to vector<8xf32>
    %258 = vector.shape_cast %257 : vector<8xf32> to vector<8x1xf32>
    %259 = tpu.reciprocal %258 {approx = true} : vector<8x1xf32> -> vector<8x1xf32>
    %260 = vector.broadcast %259 : vector<8x1xf32> to vector<8x16xf32>
    %261 = arith.mulf %256, %260 : vector<8x16xf32>
    %262 = arith.truncf %261 : vector<8x16xf32> to vector<8x16xbf16>
    %cst_77 = arith.constant dense<0.000000e+00> : vector<8x8xf32>
    %263 = tpu.matmul %262, %250, %cst_77 {dimension_numbers = #tpu.dot_dimension_numbers<[1], [0], [0], [1], [0, 0, 1, 1], [], []>} : vector<8x16xbf16>, vector<16x8xbf16>, vector<8x8xf32> -> vector<8x8xf32>
    %264 = arith.truncf %263 : vector<8x8xf32> to vector<8x8xbf16>
    %265 = vector.extract_strided_slice %239 {offsets = [0, 0], sizes = [8, 32], strides = [1, 1]} : vector<32x32xbf16> to vector<8x32xbf16>
    %cst_78 = arith.constant dense<0.000000e+00> : vector<8x32xf32>
    %266 = tpu.matmul %264, %265, %cst_78 {dimension_numbers = #tpu.dot_dimension_numbers<[1], [0], [0], [1], [0, 0, 1, 1], [], []>} : vector<8x8xbf16>, vector<8x32xbf16>, vector<8x32xf32> -> vector<8x32xf32>
    %267 = vector.extract_strided_slice %242 {offsets = [0, 8], sizes = [8, 8], strides = [1, 1]} : vector<8x32xf32> to vector<8x8xf32>
    %268 = arith.truncf %267 : vector<8x8xf32> to vector<8x8xbf16>
    %269 = vector.extract_strided_slice %243 {offsets = [0, 8], sizes = [16, 8], strides = [1, 1]} : vector<16x32xf32> to vector<16x8xf32>
    %270 = arith.truncf %269 : vector<16x8xf32> to vector<16x8xbf16>
    %271 = vector.extract_strided_slice %244 {offsets = [0, 8], sizes = [16, 8], strides = [1, 1]} : vector<16x32xf32> to vector<16x8xf32>
    %272 = arith.truncf %271 : vector<16x8xf32> to vector<16x8xbf16>
    %cst_79 = arith.constant dense<0.000000e+00> : vector<8x16xf32>
    %273 = tpu.matmul %268, %270, %cst_79 {dimension_numbers = #tpu.dot_dimension_numbers<[1], [1], [0], [0], [0, 0, 1, 0], [], []>} : vector<8x8xbf16>, vector<16x8xbf16>, vector<8x16xf32> -> vector<8x16xf32>
    %cst_80 = arith.constant dense<0xFF800000> : vector<8xf32>
    %274 = vector.multi_reduction <maximumf>, %273, %cst_80 [1] : vector<8x16xf32> to vector<8xf32>
    %275 = vector.shape_cast %274 : vector<8xf32> to vector<8x1xf32>
    %276 = vector.broadcast %275 : vector<8x1xf32> to vector<8x16xf32>
    %277 = arith.subf %273, %276 : vector<8x16xf32>
    %278 = math.exp %277 : vector<8x16xf32>
    %cst_81 = arith.constant dense<0.000000e+00> : vector<8xf32>
    %279 = vector.multi_reduction <add>, %278, %cst_81 [1] : vector<8x16xf32> to vector<8xf32>
    %280 = vector.shape_cast %279 : vector<8xf32> to vector<8x1xf32>
    %281 = tpu.reciprocal %280 {approx = true} : vector<8x1xf32> -> vector<8x1xf32>
    %282 = vector.broadcast %281 : vector<8x1xf32> to vector<8x16xf32>
    %283 = arith.mulf %278, %282 : vector<8x16xf32>
    %284 = arith.truncf %283 : vector<8x16xf32> to vector<8x16xbf16>
    %cst_82 = arith.constant dense<0.000000e+00> : vector<8x8xf32>
    %285 = tpu.matmul %284, %272, %cst_82 {dimension_numbers = #tpu.dot_dimension_numbers<[1], [0], [0], [1], [0, 0, 1, 1], [], []>} : vector<8x16xbf16>, vector<16x8xbf16>, vector<8x8xf32> -> vector<8x8xf32>
    %286 = arith.truncf %285 : vector<8x8xf32> to vector<8x8xbf16>
    %287 = vector.extract_strided_slice %239 {offsets = [8, 0], sizes = [8, 32], strides = [1, 1]} : vector<32x32xbf16> to vector<8x32xbf16>
    %cst_83 = arith.constant dense<0.000000e+00> : vector<8x32xf32>
    %288 = tpu.matmul %286, %287, %cst_83 {dimension_numbers = #tpu.dot_dimension_numbers<[1], [0], [0], [1], [0, 0, 1, 1], [], []>} : vector<8x8xbf16>, vector<8x32xbf16>, vector<8x32xf32> -> vector<8x32xf32>
    %289 = vector.extract_strided_slice %242 {offsets = [0, 16], sizes = [8, 8], strides = [1, 1]} : vector<8x32xf32> to vector<8x8xf32>
    %290 = arith.truncf %289 : vector<8x8xf32> to vector<8x8xbf16>
    %291 = vector.extract_strided_slice %243 {offsets = [0, 16], sizes = [16, 8], strides = [1, 1]} : vector<16x32xf32> to vector<16x8xf32>
    %292 = arith.truncf %291 : vector<16x8xf32> to vector<16x8xbf16>
    %293 = vector.extract_strided_slice %244 {offsets = [0, 16], sizes = [16, 8], strides = [1, 1]} : vector<16x32xf32> to vector<16x8xf32>
    %294 = arith.truncf %293 : vector<16x8xf32> to vector<16x8xbf16>
    %cst_84 = arith.constant dense<0.000000e+00> : vector<8x16xf32>
    %295 = tpu.matmul %290, %292, %cst_84 {dimension_numbers = #tpu.dot_dimension_numbers<[1], [1], [0], [0], [0, 0, 1, 0], [], []>} : vector<8x8xbf16>, vector<16x8xbf16>, vector<8x16xf32> -> vector<8x16xf32>
    %cst_85 = arith.constant dense<0xFF800000> : vector<8xf32>
    %296 = vector.multi_reduction <maximumf>, %295, %cst_85 [1] : vector<8x16xf32> to vector<8xf32>
    %297 = vector.shape_cast %296 : vector<8xf32> to vector<8x1xf32>
    %298 = vector.broadcast %297 : vector<8x1xf32> to vector<8x16xf32>
    %299 = arith.subf %295, %298 : vector<8x16xf32>
    %300 = math.exp %299 : vector<8x16xf32>
    %cst_86 = arith.constant dense<0.000000e+00> : vector<8xf32>
    %301 = vector.multi_reduction <add>, %300, %cst_86 [1] : vector<8x16xf32> to vector<8xf32>
    %302 = vector.shape_cast %301 : vector<8xf32> to vector<8x1xf32>
    %303 = tpu.reciprocal %302 {approx = true} : vector<8x1xf32> -> vector<8x1xf32>
    %304 = vector.broadcast %303 : vector<8x1xf32> to vector<8x16xf32>
    %305 = arith.mulf %300, %304 : vector<8x16xf32>
    %306 = arith.truncf %305 : vector<8x16xf32> to vector<8x16xbf16>
    %cst_87 = arith.constant dense<0.000000e+00> : vector<8x8xf32>
    %307 = tpu.matmul %306, %294, %cst_87 {dimension_numbers = #tpu.dot_dimension_numbers<[1], [0], [0], [1], [0, 0, 1, 1], [], []>} : vector<8x16xbf16>, vector<16x8xbf16>, vector<8x8xf32> -> vector<8x8xf32>
    %308 = arith.truncf %307 : vector<8x8xf32> to vector<8x8xbf16>
    %309 = vector.extract_strided_slice %239 {offsets = [16, 0], sizes = [8, 32], strides = [1, 1]} : vector<32x32xbf16> to vector<8x32xbf16>
    %cst_88 = arith.constant dense<0.000000e+00> : vector<8x32xf32>
    %310 = tpu.matmul %308, %309, %cst_88 {dimension_numbers = #tpu.dot_dimension_numbers<[1], [0], [0], [1], [0, 0, 1, 1], [], []>} : vector<8x8xbf16>, vector<8x32xbf16>, vector<8x32xf32> -> vector<8x32xf32>
    %311 = vector.extract_strided_slice %242 {offsets = [0, 24], sizes = [8, 8], strides = [1, 1]} : vector<8x32xf32> to vector<8x8xf32>
    %312 = arith.truncf %311 : vector<8x8xf32> to vector<8x8xbf16>
    %313 = vector.extract_strided_slice %243 {offsets = [0, 24], sizes = [16, 8], strides = [1, 1]} : vector<16x32xf32> to vector<16x8xf32>
    %314 = arith.truncf %313 : vector<16x8xf32> to vector<16x8xbf16>
    %315 = vector.extract_strided_slice %244 {offsets = [0, 24], sizes = [16, 8], strides = [1, 1]} : vector<16x32xf32> to vector<16x8xf32>
    %316 = arith.truncf %315 : vector<16x8xf32> to vector<16x8xbf16>
    %cst_89 = arith.constant dense<0.000000e+00> : vector<8x16xf32>
    %317 = tpu.matmul %312, %314, %cst_89 {dimension_numbers = #tpu.dot_dimension_numbers<[1], [1], [0], [0], [0, 0, 1, 0], [], []>} : vector<8x8xbf16>, vector<16x8xbf16>, vector<8x16xf32> -> vector<8x16xf32>
    %cst_90 = arith.constant dense<0xFF800000> : vector<8xf32>
    %318 = vector.multi_reduction <maximumf>, %317, %cst_90 [1] : vector<8x16xf32> to vector<8xf32>
    %319 = vector.shape_cast %318 : vector<8xf32> to vector<8x1xf32>
    %320 = vector.broadcast %319 : vector<8x1xf32> to vector<8x16xf32>
    %321 = arith.subf %317, %320 : vector<8x16xf32>
    %322 = math.exp %321 : vector<8x16xf32>
    %cst_91 = arith.constant dense<0.000000e+00> : vector<8xf32>
    %323 = vector.multi_reduction <add>, %322, %cst_91 [1] : vector<8x16xf32> to vector<8xf32>
    %324 = vector.shape_cast %323 : vector<8xf32> to vector<8x1xf32>
    %325 = tpu.reciprocal %324 {approx = true} : vector<8x1xf32> -> vector<8x1xf32>
    %326 = vector.broadcast %325 : vector<8x1xf32> to vector<8x16xf32>
    %327 = arith.mulf %322, %326 : vector<8x16xf32>
    %328 = arith.truncf %327 : vector<8x16xf32> to vector<8x16xbf16>
    %cst_92 = arith.constant dense<0.000000e+00> : vector<8x8xf32>
    %329 = tpu.matmul %328, %316, %cst_92 {dimension_numbers = #tpu.dot_dimension_numbers<[1], [0], [0], [1], [0, 0, 1, 1], [], []>} : vector<8x16xbf16>, vector<16x8xbf16>, vector<8x8xf32> -> vector<8x8xf32>
    %330 = arith.truncf %329 : vector<8x8xf32> to vector<8x8xbf16>
    %331 = vector.extract_strided_slice %239 {offsets = [24, 0], sizes = [8, 32], strides = [1, 1]} : vector<32x32xbf16> to vector<8x32xbf16>
    %cst_93 = arith.constant dense<0.000000e+00> : vector<8x32xf32>
    %332 = tpu.matmul %330, %331, %cst_93 {dimension_numbers = #tpu.dot_dimension_numbers<[1], [0], [0], [1], [0, 0, 1, 1], [], []>} : vector<8x8xbf16>, vector<8x32xbf16>, vector<8x32xf32> -> vector<8x32xf32>
    %333 = arith.addf %266, %288 : vector<8x32xf32>
    %334 = arith.addf %310, %332 : vector<8x32xf32>
    %335 = arith.addf %333, %334 : vector<8x32xf32>
    %c0_94 = arith.constant 0 : index
    %c0_95 = arith.constant 0 : index
    %336 = vector.load %arg11[%c0_94, %c0_95] : memref<1x32xf32, #tpu.memory_space<vmem>>, vector<1x32xf32>
    %337 = vector.broadcast %336 : vector<1x32xf32> to vector<8x32xf32>
    %338 = arith.addf %335, %337 : vector<8x32xf32>
    %339 = vector.extract_strided_slice %232 {offsets = [8, 0], sizes = [8, 32], strides = [1, 1]} : vector<16x32xf32> to vector<8x32xf32>
    %cst_96 = arith.constant 0.353553385 : f32
    %340 = vector.broadcast %cst_96 : f32 to vector<8x32xf32>
    %341 = arith.mulf %339, %340 : vector<8x32xf32>
    %342 = vector.extract_strided_slice %238 {offsets = [16, 0], sizes = [16, 32], strides = [1, 1]} : vector<32x64xf32> to vector<16x32xf32>
    %343 = vector.extract_strided_slice %238 {offsets = [16, 32], sizes = [16, 32], strides = [1, 1]} : vector<32x64xf32> to vector<16x32xf32>
    %344 = vector.extract_strided_slice %341 {offsets = [0, 0], sizes = [8, 8], strides = [1, 1]} : vector<8x32xf32> to vector<8x8xf32>
    %345 = arith.truncf %344 : vector<8x8xf32> to vector<8x8xbf16>
    %346 = vector.extract_strided_slice %342 {offsets = [0, 0], sizes = [16, 8], strides = [1, 1]} : vector<16x32xf32> to vector<16x8xf32>
    %347 = arith.truncf %346 : vector<16x8xf32> to vector<16x8xbf16>
    %348 = vector.extract_strided_slice %343 {offsets = [0, 0], sizes = [16, 8], strides = [1, 1]} : vector<16x32xf32> to vector<16x8xf32>
    %349 = arith.truncf %348 : vector<16x8xf32> to vector<16x8xbf16>
    %cst_97 = arith.constant dense<0.000000e+00> : vector<8x16xf32>
    %350 = tpu.matmul %345, %347, %cst_97 {dimension_numbers = #tpu.dot_dimension_numbers<[1], [1], [0], [0], [0, 0, 1, 0], [], []>} : vector<8x8xbf16>, vector<16x8xbf16>, vector<8x16xf32> -> vector<8x16xf32>
    %cst_98 = arith.constant dense<0xFF800000> : vector<8xf32>
    %351 = vector.multi_reduction <maximumf>, %350, %cst_98 [1] : vector<8x16xf32> to vector<8xf32>
    %352 = vector.shape_cast %351 : vector<8xf32> to vector<8x1xf32>
    %353 = vector.broadcast %352 : vector<8x1xf32> to vector<8x16xf32>
    %354 = arith.subf %350, %353 : vector<8x16xf32>
    %355 = math.exp %354 : vector<8x16xf32>
    %cst_99 = arith.constant dense<0.000000e+00> : vector<8xf32>
    %356 = vector.multi_reduction <add>, %355, %cst_99 [1] : vector<8x16xf32> to vector<8xf32>
    %357 = vector.shape_cast %356 : vector<8xf32> to vector<8x1xf32>
    %358 = tpu.reciprocal %357 {approx = true} : vector<8x1xf32> -> vector<8x1xf32>
    %359 = vector.broadcast %358 : vector<8x1xf32> to vector<8x16xf32>
    %360 = arith.mulf %355, %359 : vector<8x16xf32>
    %361 = arith.truncf %360 : vector<8x16xf32> to vector<8x16xbf16>
    %cst_100 = arith.constant dense<0.000000e+00> : vector<8x8xf32>
    %362 = tpu.matmul %361, %349, %cst_100 {dimension_numbers = #tpu.dot_dimension_numbers<[1], [0], [0], [1], [0, 0, 1, 1], [], []>} : vector<8x16xbf16>, vector<16x8xbf16>, vector<8x8xf32> -> vector<8x8xf32>
    %363 = arith.truncf %362 : vector<8x8xf32> to vector<8x8xbf16>
    %364 = vector.extract_strided_slice %239 {offsets = [0, 0], sizes = [8, 32], strides = [1, 1]} : vector<32x32xbf16> to vector<8x32xbf16>
    %cst_101 = arith.constant dense<0.000000e+00> : vector<8x32xf32>
    %365 = tpu.matmul %363, %364, %cst_101 {dimension_numbers = #tpu.dot_dimension_numbers<[1], [0], [0], [1], [0, 0, 1, 1], [], []>} : vector<8x8xbf16>, vector<8x32xbf16>, vector<8x32xf32> -> vector<8x32xf32>
    %366 = vector.extract_strided_slice %341 {offsets = [0, 8], sizes = [8, 8], strides = [1, 1]} : vector<8x32xf32> to vector<8x8xf32>
    %367 = arith.truncf %366 : vector<8x8xf32> to vector<8x8xbf16>
    %368 = vector.extract_strided_slice %342 {offsets = [0, 8], sizes = [16, 8], strides = [1, 1]} : vector<16x32xf32> to vector<16x8xf32>
    %369 = arith.truncf %368 : vector<16x8xf32> to vector<16x8xbf16>
    %370 = vector.extract_strided_slice %343 {offsets = [0, 8], sizes = [16, 8], strides = [1, 1]} : vector<16x32xf32> to vector<16x8xf32>
    %371 = arith.truncf %370 : vector<16x8xf32> to vector<16x8xbf16>
    %cst_102 = arith.constant dense<0.000000e+00> : vector<8x16xf32>
    %372 = tpu.matmul %367, %369, %cst_102 {dimension_numbers = #tpu.dot_dimension_numbers<[1], [1], [0], [0], [0, 0, 1, 0], [], []>} : vector<8x8xbf16>, vector<16x8xbf16>, vector<8x16xf32> -> vector<8x16xf32>
    %cst_103 = arith.constant dense<0xFF800000> : vector<8xf32>
    %373 = vector.multi_reduction <maximumf>, %372, %cst_103 [1] : vector<8x16xf32> to vector<8xf32>
    %374 = vector.shape_cast %373 : vector<8xf32> to vector<8x1xf32>
    %375 = vector.broadcast %374 : vector<8x1xf32> to vector<8x16xf32>
    %376 = arith.subf %372, %375 : vector<8x16xf32>
    %377 = math.exp %376 : vector<8x16xf32>
    %cst_104 = arith.constant dense<0.000000e+00> : vector<8xf32>
    %378 = vector.multi_reduction <add>, %377, %cst_104 [1] : vector<8x16xf32> to vector<8xf32>
    %379 = vector.shape_cast %378 : vector<8xf32> to vector<8x1xf32>
    %380 = tpu.reciprocal %379 {approx = true} : vector<8x1xf32> -> vector<8x1xf32>
    %381 = vector.broadcast %380 : vector<8x1xf32> to vector<8x16xf32>
    %382 = arith.mulf %377, %381 : vector<8x16xf32>
    %383 = arith.truncf %382 : vector<8x16xf32> to vector<8x16xbf16>
    %cst_105 = arith.constant dense<0.000000e+00> : vector<8x8xf32>
    %384 = tpu.matmul %383, %371, %cst_105 {dimension_numbers = #tpu.dot_dimension_numbers<[1], [0], [0], [1], [0, 0, 1, 1], [], []>} : vector<8x16xbf16>, vector<16x8xbf16>, vector<8x8xf32> -> vector<8x8xf32>
    %385 = arith.truncf %384 : vector<8x8xf32> to vector<8x8xbf16>
    %386 = vector.extract_strided_slice %239 {offsets = [8, 0], sizes = [8, 32], strides = [1, 1]} : vector<32x32xbf16> to vector<8x32xbf16>
    %cst_106 = arith.constant dense<0.000000e+00> : vector<8x32xf32>
    %387 = tpu.matmul %385, %386, %cst_106 {dimension_numbers = #tpu.dot_dimension_numbers<[1], [0], [0], [1], [0, 0, 1, 1], [], []>} : vector<8x8xbf16>, vector<8x32xbf16>, vector<8x32xf32> -> vector<8x32xf32>
    %388 = vector.extract_strided_slice %341 {offsets = [0, 16], sizes = [8, 8], strides = [1, 1]} : vector<8x32xf32> to vector<8x8xf32>
    %389 = arith.truncf %388 : vector<8x8xf32> to vector<8x8xbf16>
    %390 = vector.extract_strided_slice %342 {offsets = [0, 16], sizes = [16, 8], strides = [1, 1]} : vector<16x32xf32> to vector<16x8xf32>
    %391 = arith.truncf %390 : vector<16x8xf32> to vector<16x8xbf16>
    %392 = vector.extract_strided_slice %343 {offsets = [0, 16], sizes = [16, 8], strides = [1, 1]} : vector<16x32xf32> to vector<16x8xf32>
    %393 = arith.truncf %392 : vector<16x8xf32> to vector<16x8xbf16>
    %cst_107 = arith.constant dense<0.000000e+00> : vector<8x16xf32>
    %394 = tpu.matmul %389, %391, %cst_107 {dimension_numbers = #tpu.dot_dimension_numbers<[1], [1], [0], [0], [0, 0, 1, 0], [], []>} : vector<8x8xbf16>, vector<16x8xbf16>, vector<8x16xf32> -> vector<8x16xf32>
    %cst_108 = arith.constant dense<0xFF800000> : vector<8xf32>
    %395 = vector.multi_reduction <maximumf>, %394, %cst_108 [1] : vector<8x16xf32> to vector<8xf32>
    %396 = vector.shape_cast %395 : vector<8xf32> to vector<8x1xf32>
    %397 = vector.broadcast %396 : vector<8x1xf32> to vector<8x16xf32>
    %398 = arith.subf %394, %397 : vector<8x16xf32>
    %399 = math.exp %398 : vector<8x16xf32>
    %cst_109 = arith.constant dense<0.000000e+00> : vector<8xf32>
    %400 = vector.multi_reduction <add>, %399, %cst_109 [1] : vector<8x16xf32> to vector<8xf32>
    %401 = vector.shape_cast %400 : vector<8xf32> to vector<8x1xf32>
    %402 = tpu.reciprocal %401 {approx = true} : vector<8x1xf32> -> vector<8x1xf32>
    %403 = vector.broadcast %402 : vector<8x1xf32> to vector<8x16xf32>
    %404 = arith.mulf %399, %403 : vector<8x16xf32>
    %405 = arith.truncf %404 : vector<8x16xf32> to vector<8x16xbf16>
    %cst_110 = arith.constant dense<0.000000e+00> : vector<8x8xf32>
    %406 = tpu.matmul %405, %393, %cst_110 {dimension_numbers = #tpu.dot_dimension_numbers<[1], [0], [0], [1], [0, 0, 1, 1], [], []>} : vector<8x16xbf16>, vector<16x8xbf16>, vector<8x8xf32> -> vector<8x8xf32>
    %407 = arith.truncf %406 : vector<8x8xf32> to vector<8x8xbf16>
    %408 = vector.extract_strided_slice %239 {offsets = [16, 0], sizes = [8, 32], strides = [1, 1]} : vector<32x32xbf16> to vector<8x32xbf16>
    %cst_111 = arith.constant dense<0.000000e+00> : vector<8x32xf32>
    %409 = tpu.matmul %407, %408, %cst_111 {dimension_numbers = #tpu.dot_dimension_numbers<[1], [0], [0], [1], [0, 0, 1, 1], [], []>} : vector<8x8xbf16>, vector<8x32xbf16>, vector<8x32xf32> -> vector<8x32xf32>
    %410 = vector.extract_strided_slice %341 {offsets = [0, 24], sizes = [8, 8], strides = [1, 1]} : vector<8x32xf32> to vector<8x8xf32>
    %411 = arith.truncf %410 : vector<8x8xf32> to vector<8x8xbf16>
    %412 = vector.extract_strided_slice %342 {offsets = [0, 24], sizes = [16, 8], strides = [1, 1]} : vector<16x32xf32> to vector<16x8xf32>
    %413 = arith.truncf %412 : vector<16x8xf32> to vector<16x8xbf16>
    %414 = vector.extract_strided_slice %343 {offsets = [0, 24], sizes = [16, 8], strides = [1, 1]} : vector<16x32xf32> to vector<16x8xf32>
    %415 = arith.truncf %414 : vector<16x8xf32> to vector<16x8xbf16>
    %cst_112 = arith.constant dense<0.000000e+00> : vector<8x16xf32>
    %416 = tpu.matmul %411, %413, %cst_112 {dimension_numbers = #tpu.dot_dimension_numbers<[1], [1], [0], [0], [0, 0, 1, 0], [], []>} : vector<8x8xbf16>, vector<16x8xbf16>, vector<8x16xf32> -> vector<8x16xf32>
    %cst_113 = arith.constant dense<0xFF800000> : vector<8xf32>
    %417 = vector.multi_reduction <maximumf>, %416, %cst_113 [1] : vector<8x16xf32> to vector<8xf32>
    %418 = vector.shape_cast %417 : vector<8xf32> to vector<8x1xf32>
    %419 = vector.broadcast %418 : vector<8x1xf32> to vector<8x16xf32>
    %420 = arith.subf %416, %419 : vector<8x16xf32>
    %421 = math.exp %420 : vector<8x16xf32>
    %cst_114 = arith.constant dense<0.000000e+00> : vector<8xf32>
    %422 = vector.multi_reduction <add>, %421, %cst_114 [1] : vector<8x16xf32> to vector<8xf32>
    %423 = vector.shape_cast %422 : vector<8xf32> to vector<8x1xf32>
    %424 = tpu.reciprocal %423 {approx = true} : vector<8x1xf32> -> vector<8x1xf32>
    %425 = vector.broadcast %424 : vector<8x1xf32> to vector<8x16xf32>
    %426 = arith.mulf %421, %425 : vector<8x16xf32>
    %427 = arith.truncf %426 : vector<8x16xf32> to vector<8x16xbf16>
    %cst_115 = arith.constant dense<0.000000e+00> : vector<8x8xf32>
    %428 = tpu.matmul %427, %415, %cst_115 {dimension_numbers = #tpu.dot_dimension_numbers<[1], [0], [0], [1], [0, 0, 1, 1], [], []>} : vector<8x16xbf16>, vector<16x8xbf16>, vector<8x8xf32> -> vector<8x8xf32>
    %429 = arith.truncf %428 : vector<8x8xf32> to vector<8x8xbf16>
    %430 = vector.extract_strided_slice %239 {offsets = [24, 0], sizes = [8, 32], strides = [1, 1]} : vector<32x32xbf16> to vector<8x32xbf16>
    %cst_116 = arith.constant dense<0.000000e+00> : vector<8x32xf32>
    %431 = tpu.matmul %429, %430, %cst_116 {dimension_numbers = #tpu.dot_dimension_numbers<[1], [0], [0], [1], [0, 0, 1, 1], [], []>} : vector<8x8xbf16>, vector<8x32xbf16>, vector<8x32xf32> -> vector<8x32xf32>
    %432 = arith.addf %365, %387 : vector<8x32xf32>
    %433 = arith.addf %409, %431 : vector<8x32xf32>
    %434 = arith.addf %432, %433 : vector<8x32xf32>
    %c0_117 = arith.constant 0 : index
    %c0_118 = arith.constant 0 : index
    %435 = vector.load %arg11[%c0_117, %c0_118] : memref<1x32xf32, #tpu.memory_space<vmem>>, vector<1x32xf32>
    %436 = vector.broadcast %435 : vector<1x32xf32> to vector<8x32xf32>
    %437 = arith.addf %434, %436 : vector<8x32xf32>
    %438 = tpu.concatenate %338, %437 in 0 : vector<8x32xf32>, vector<8x32xf32> -> vector<16x32xf32>
    %439 = arith.addf %232, %438 : vector<16x32xf32>
    %cst_119 = arith.constant dense<0.000000e+00> : vector<16xf32>
    %440 = vector.multi_reduction <add>, %439, %cst_119 [1] : vector<16x32xf32> to vector<16xf32>
    %441 = vector.shape_cast %440 : vector<16xf32> to vector<16x1xf32>
    %cst_120 = arith.constant 3.200000e+01 : f32
    %442 = vector.broadcast %cst_120 : f32 to vector<16x1xf32>
    %443 = arith.divf %441, %442 : vector<16x1xf32>
    %444 = vector.broadcast %443 : vector<16x1xf32> to vector<16x32xf32>
    %445 = arith.subf %439, %444 : vector<16x32xf32>
    %446 = arith.mulf %445, %445 : vector<16x32xf32>
    %cst_121 = arith.constant dense<0.000000e+00> : vector<16xf32>
    %447 = vector.multi_reduction <add>, %446, %cst_121 [1] : vector<16x32xf32> to vector<16xf32>
    %448 = vector.shape_cast %447 : vector<16xf32> to vector<16x1xf32>
    %cst_122 = arith.constant 3.200000e+01 : f32
    %449 = vector.broadcast %cst_122 : f32 to vector<16x1xf32>
    %450 = arith.divf %448, %449 : vector<16x1xf32>
    %cst_123 = arith.constant 9.99999974E-6 : f32
    %451 = vector.broadcast %cst_123 : f32 to vector<16x1xf32>
    %452 = arith.addf %450, %451 : vector<16x1xf32>
    %453 = math.rsqrt %452 : vector<16x1xf32>
    %454 = vector.broadcast %453 : vector<16x1xf32> to vector<16x32xf32>
    %455 = arith.mulf %445, %454 : vector<16x32xf32>
    %c0_124 = arith.constant 0 : index
    %c0_125 = arith.constant 0 : index
    %456 = vector.load %arg12[%c0_124, %c0_125] : memref<1x32xf32, #tpu.memory_space<vmem>>, vector<1x32xf32>
    %457 = vector.broadcast %456 : vector<1x32xf32> to vector<16x32xf32>
    %458 = arith.mulf %455, %457 : vector<16x32xf32>
    %c0_126 = arith.constant 0 : index
    %c0_127 = arith.constant 0 : index
    %459 = vector.load %arg13[%c0_126, %c0_127] : memref<1x32xf32, #tpu.memory_space<vmem>>, vector<1x32xf32>
    %460 = vector.broadcast %459 : vector<1x32xf32> to vector<16x32xf32>
    %461 = arith.addf %458, %460 : vector<16x32xf32>
    %c0_128 = arith.constant 0 : index
    %c0_129 = arith.constant 0 : index
    %462 = vector.load %arg14[%c0_128, %c0_129] : memref<32x64xbf16, #tpu.memory_space<vmem>>, vector<32x64xbf16>
    %463 = arith.truncf %461 : vector<16x32xf32> to vector<16x32xbf16>
    %cst_130 = arith.constant dense<0.000000e+00> : vector<16x64xf32>
    %464 = tpu.matmul %463, %462, %cst_130 {dimension_numbers = #tpu.dot_dimension_numbers<[1], [0], [0], [1], [0, 0, 1, 1], [], []>} : vector<16x32xbf16>, vector<32x64xbf16>, vector<16x64xf32> -> vector<16x64xf32>
    %c0_131 = arith.constant 0 : index
    %c0_132 = arith.constant 0 : index
    %465 = vector.load %arg15[%c0_131, %c0_132] : memref<1x64xf32, #tpu.memory_space<vmem>>, vector<1x64xf32>
    %466 = vector.broadcast %465 : vector<1x64xf32> to vector<16x64xf32>
    %467 = arith.addf %464, %466 : vector<16x64xf32>
    %cst_133 = arith.constant 0.000000e+00 : f32
    %468 = vector.broadcast %cst_133 : f32 to vector<16x64xf32>
    %469 = arith.maximumf %467, %468 : vector<16x64xf32>
    %c0_134 = arith.constant 0 : index
    %c0_135 = arith.constant 0 : index
    %470 = vector.load %arg16[%c0_134, %c0_135] : memref<64x32xbf16, #tpu.memory_space<vmem>>, vector<64x32xbf16>
    %471 = arith.truncf %469 : vector<16x64xf32> to vector<16x64xbf16>
    %cst_136 = arith.constant dense<0.000000e+00> : vector<16x32xf32>
    %472 = tpu.matmul %471, %470, %cst_136 {dimension_numbers = #tpu.dot_dimension_numbers<[1], [0], [0], [1], [0, 0, 1, 1], [], []>} : vector<16x64xbf16>, vector<64x32xbf16>, vector<16x32xf32> -> vector<16x32xf32>
    %c0_137 = arith.constant 0 : index
    %c0_138 = arith.constant 0 : index
    %473 = vector.load %arg17[%c0_137, %c0_138] : memref<1x32xf32, #tpu.memory_space<vmem>>, vector<1x32xf32>
    %474 = vector.broadcast %473 : vector<1x32xf32> to vector<16x32xf32>
    %475 = arith.addf %472, %474 : vector<16x32xf32>
    %476 = arith.addf %461, %475 : vector<16x32xf32>
    %cst_139 = arith.constant dense<0.000000e+00> : vector<16xf32>
    %477 = vector.multi_reduction <add>, %476, %cst_139 [1] : vector<16x32xf32> to vector<16xf32>
    %478 = vector.shape_cast %477 : vector<16xf32> to vector<16x1xf32>
    %cst_140 = arith.constant 3.200000e+01 : f32
    %479 = vector.broadcast %cst_140 : f32 to vector<16x1xf32>
    %480 = arith.divf %478, %479 : vector<16x1xf32>
    %481 = vector.broadcast %480 : vector<16x1xf32> to vector<16x32xf32>
    %482 = arith.subf %476, %481 : vector<16x32xf32>
    %483 = arith.mulf %482, %482 : vector<16x32xf32>
    %cst_141 = arith.constant dense<0.000000e+00> : vector<16xf32>
    %484 = vector.multi_reduction <add>, %483, %cst_141 [1] : vector<16x32xf32> to vector<16xf32>
    %485 = vector.shape_cast %484 : vector<16xf32> to vector<16x1xf32>
    %cst_142 = arith.constant 3.200000e+01 : f32
    %486 = vector.broadcast %cst_142 : f32 to vector<16x1xf32>
    %487 = arith.divf %485, %486 : vector<16x1xf32>
    %cst_143 = arith.constant 9.99999974E-6 : f32
    %488 = vector.broadcast %cst_143 : f32 to vector<16x1xf32>
    %489 = arith.addf %487, %488 : vector<16x1xf32>
    %490 = math.rsqrt %489 : vector<16x1xf32>
    %491 = vector.broadcast %490 : vector<16x1xf32> to vector<16x32xf32>
    %492 = arith.mulf %482, %491 : vector<16x32xf32>
    %c0_144 = arith.constant 0 : index
    %c0_145 = arith.constant 0 : index
    %493 = vector.load %arg18[%c0_144, %c0_145] : memref<1x32xf32, #tpu.memory_space<vmem>>, vector<1x32xf32>
    %494 = vector.broadcast %493 : vector<1x32xf32> to vector<16x32xf32>
    %495 = arith.mulf %492, %494 : vector<16x32xf32>
    %c0_146 = arith.constant 0 : index
    %c0_147 = arith.constant 0 : index
    %496 = vector.load %arg19[%c0_146, %c0_147] : memref<1x32xf32, #tpu.memory_space<vmem>>, vector<1x32xf32>
    %497 = vector.broadcast %496 : vector<1x32xf32> to vector<16x32xf32>
    %498 = arith.addf %495, %497 : vector<16x32xf32>
    %499 = vector.shape_cast %498 : vector<16x32xf32> to vector<2x8x32xf32>
    %c0_148 = arith.constant 0 : index
    %c0_149 = arith.constant 0 : index
    %c0_150 = arith.constant 0 : index
    %500 = vector.load %arg20[%c0_148, %c0_149, %c0_150] : memref<2x8x32xf32, #tpu.memory_space<vmem>>, vector<2x8x32xf32>
    tpu.vector_store %arg20[%c0_148, %c0_149, %c0_150], %499 {strides = array<i32>} : memref<2x8x32xf32, #tpu.memory_space<vmem>>, vector<2x8x32xf32>,
    return
  }
}

</mosaic_0001>

<bundles_post_ra>
// kernel: tpu_custom_call.1
= control target key start
LH: loop header
LB: loop body
LE: loop exit
PB: predicated region body
PF: predicated region fallthrough
CT: control target
= control target key end

     0   :  { %s4580_s0 = inlined_call_operand.vmem [shape: f32[2,8,32], index: 0, kind: input, shape index: {}]   ;;  %s4581_s1 = inlined_call_operand.vmem [shape: f32[2,16,32], index: 1, kind: input, shape index: {}]   ;;  %s4582_s2 = inlined_call_operand.hbm [shape: bf16[32,96], index: 2, kind: input, shape index: {}]   ;;  %s4583_s3 = inlined_call_operand.vmem [shape: f32[1,96], index: 3, kind: input, shape index: {}]   ;;  %s4584_s4 = inlined_call_operand.hbm [shape: bf16[32,32], index: 4, kind: input, shape index: {}]   ;;  %s4585_s5 = inlined_call_operand.vmem [shape: f32[1,32], index: 5, kind: input, shape index: {}]   ;;  %s4586_s6 = inlined_call_operand.vmem [shape: f32[1,32], index: 6, kind: input, shape index: {}]   ;;  %s4587_s7 = inlined_call_operand.vmem [shape: f32[1,32], index: 7, kind: input, shape index: {}]   ;;  %s4588_s8 = inlined_call_operand.hbm [shape: bf16[32,64], index: 8, kind: input, shape index: {}]   ;;  %s4589_s9 = inlined_call_operand.vmem [shape: f32[1,64], index: 9, kind: input, shape index: {}]   ;;  %s4590_s10 = inlined_call_operand.hbm [shape: bf16[32,32], index: 10, kind: input, shape index: {}]   ;;  %s4591_s11 = inlined_call_operand.vmem [shape: f32[1,32], index: 11, kind: input, shape index: {}]   ;;  %s4592_s12 = inlined_call_operand.vmem [shape: f32[1,32], index: 12, kind: input, shape index: {}]   ;;  %s4593_s13 = inlined_call_operand.vmem [shape: f32[1,32], index: 13, kind: input, shape index: {}]   ;;  %s4594_s14 = inlined_call_operand.hbm [shape: bf16[32,64], index: 14, kind: input, shape index: {}]   ;;  %s4595_s15 = inlined_call_operand.vmem [shape: f32[1,64], index: 15, kind: input, shape index: {}]   ;;  %s4596_s16 = inlined_call_operand.vmem [shape: bf16[64,32], index: 16, kind: input, shape index: {}]   ;;  %s4597_s17 = inlined_call_operand.vmem [shape: f32[1,32], index: 17, kind: input, shape index: {}]   ;;  %s4598_s18 = inlined_call_operand.vmem [shape: f32[1,32], index: 18, kind: input, shape index: {}]   ;;  %s4599_s19 = inlined_call_operand.vmem [shape: f32[1,32], index: 19, kind: input, shape index: {}]   ;;  %s4600_s20 = inlined_call_operand.hbm [shape: f32[2,8,32], index: 20, kind: output, shape index: {}]  }
   0x1   :  { %4603 = sst [smem:[#allocation16_spill]] %s4580_s0 }
   0x2   :  { %4604 = sst [smem:[#allocation17_spill]] %s4581_s1 }
   0x3   :  { %4605 = sst [smem:[#allocation18_spill]] %s4582_s2 }
   0x4   :  { %4606 = sst [smem:[#allocation19_spill]] %s4583_s3 }
   0x5   :  { %4607 = sst [smem:[#allocation20_spill]] %s4584_s4 }
   0x6   :  { %25 = vsyncpa [#allocation3], 0 }
   0x7   :  { %26 = vsyncpa [#allocation6], 0 }
   0x8   :  { %27 = vsyncpa [#allocation9], 0 }
   0x9   :  { %28 = vsyncpa [#allocation4], 0  ;;  %s3865_s1 = smov [#allocation5]   ;;  %s3866_s23 = smov [#allocation8]  }
   0xa   :  { %s52_s22 = sshll.u32 %s3865_s1, 4  ;;  %s84_s24 = sshll.u32 %s3866_s23, 4  ;;  %s53_s22 = int_to_ptr.vmem [resolvable:$true] %s52_s22  ;;  %s85_s24 = int_to_ptr.vmem [resolvable:$true] %s84_s24 }
   0xb   :  { %s3745_s2 = scalar_lea.vmem %s53_s22, 256  ;;  %p3750_p1 = scmp.lt.s32.totalorder %s53_s22, %s53_s22 }
   0xc   :  { %p3746_p0 = scmp.ne.s32.totalorder %s53_s22, %s3745_s2  ;;  %p3751_p2 = scmp.lt.s32.totalorder %s3745_s2, %s3745_s2 }
   0xe   :  { %p3752_p3 = por %p3751_p2, %p3750_p1 }
  0x10   :  { %p3753_p4 = pnand %p3752_p3, %p3746_p0 }
  0x12   :  { %3756 = shalt.err (!%p3753_p4)
}
  0x13   :  { %s3867_s25 = smov 64   ;;  %s3868_s3 = smov 4  }
  0x14   :  { %s4608_s28 = sld [smem:[#allocation20_spill]]  ;;  %s3765_s4 = scalar_lea.vmem %s85_s24, 256 }
  0x15   :  { %p3766_p5 = scmp.ne.s32.totalorder %s85_s24, %s3765_s4  ;;  %p3770_p6 = scmp.lt.s32.totalorder %s85_s24, %s85_s24 }
  0x16   :  { %p3771_p7 = scmp.lt.s32.totalorder %s3765_s4, %s3765_s4 }
  0x18   :  { %p3772_p8 = por %p3771_p7, %p3770_p6 }
  0x1a   :  { %58 = dma.hbm_to_vmem [thread:$0]  %s4608_s28, 256, %s53_s22, [#allocation6], %s3867_s25, %s3867_s25, %s3868_s3  }
  0x1b   :  { %p3773_p9 = pnand %p3772_p8, %p3766_p5 }
  0x1d   :  { %3776 = shalt.err (!%p3773_p9)
}
  0x1e   :  { %90 = dma.hbm_to_vmem [thread:$0]  %s4590_s10, 256, %s85_s24, [#allocation9], %s3867_s25, %s3867_s25, %s3868_s3  }
  0x1f   :  { %s3869_s0 = smov [#allocation2]   ;;  %s3870_s1 = smov [#allocation7]  }
  0x20   :  { %s38_s21 = sshll.u32 %s3869_s0, 4  ;;  %s70_s23 = sshll.u32 %s3870_s1, 4  ;;  %s39_s21 = int_to_ptr.vmem [resolvable:$true] %s38_s21  ;;  %s71_s23 = int_to_ptr.vmem [resolvable:$true] %s70_s23 }
  0x21   :  { %s3785_s22 = scalar_lea.vmem %s39_s21, 256  ;;  %p3790_p11 = scmp.lt.s32.totalorder %s39_s21, %s39_s21 }
  0x22   :  { %p3786_p10 = scmp.ne.s32.totalorder %s39_s21, %s3785_s22  ;;  %p3791_p12 = scmp.lt.s32.totalorder %s3785_s22, %s3785_s22 }
  0x24   :  { %p3792_p13 = por %p3791_p12, %p3790_p11 }
  0x26   :  { %p3793_p0 = pnand %p3792_p13, %p3786_p10 }
  0x28   :  { %3796 = shalt.err (!%p3793_p0)
}
  0x29   :  { %s4609_s27 = sld [smem:[#allocation18_spill]]  ;;  %s3805_s10 = scalar_lea.vmem %s71_s23, 256 }
  0x2a   :  { %p3806_p1 = scmp.ne.s32.totalorder %s71_s23, %s3805_s10  ;;  %p3810_p2 = scmp.lt.s32.totalorder %s71_s23, %s71_s23 }
  0x2b   :  { %p3811_p3 = scmp.lt.s32.totalorder %s3805_s10, %s3805_s10 }
  0x2d   :  { %p3812_p4 = por %p3811_p3, %p3810_p2 }
  0x2f   :  { %44 = dma.hbm_to_vmem [thread:$0]  %s4609_s27, 256, %s39_s21, [#allocation3], %s3867_s25, %s3867_s25, %s3868_s3  }
  0x30   :  { %p3813_p5 = pnand %p3812_p4, %p3806_p1 }
  0x32   :  { %3816 = shalt.err (!%p3813_p5)
}
  0x33   :  { %76 = dma.hbm_to_vmem [thread:$0]  %s4588_s8, 256, %s71_s23, [#allocation6], %s3867_s25, %s3867_s25, %s3868_s3  }
  0x34   :  { %s3871_s4 = smov [#allocation10]  }
  0x35   :  { %s102_s29 = sshll.u32 %s3871_s4, 4  ;;  %s103_s29 = int_to_ptr.vmem [resolvable:$true] %s102_s29 }
  0x36   :  { %s3825_s30 = scalar_lea.vmem %s103_s29, 256  ;;  %p3830_p7 = scmp.lt.s32.totalorder %s103_s29, %s103_s29 }
  0x37   :  { %p3826_p6 = scmp.ne.s32.totalorder %s103_s29, %s3825_s30  ;;  %p3831_p8 = scmp.lt.s32.totalorder %s3825_s30, %s3825_s30 }
  0x39   :  { %p3832_p9 = por %p3831_p8, %p3830_p7 }
  0x3b   :  { %p3833_p10 = pnand %p3832_p9, %p3826_p6 }
  0x3d   :  { %3836 = shalt.err (!%p3833_p10)
}
  0x3e   :  { %108 = dma.hbm_to_vmem [thread:$0]  %s4594_s14, 256, %s103_s29, [#allocation9], %s3867_s25, %s3867_s25, %s3868_s3  }
  0x3f   :  { %3857 = dma.done.wait [#allocation3], 256  }
  0x40   :  { %3858 = vsyncadd [#allocation3], 4294967040 }
  0x41   :  { %3859 = dma.done.wait [#allocation6], 512  }
  0x42   :  { %3860 = vsyncadd [#allocation6], 4294966784 }
  0x43   :  { %3861 = dma.done.wait [#allocation9], 512  }
  0x44   :  { %3862 = vsyncadd [#allocation9], 4294966784  ;;  %v3872_v0 = vmov 0.0   ;;  %vm3873_vm0 = vmmov 0   ;;  %v3650_v1 = vld [vmem:[#allocation2 + $0x8] sm:$0xff]   ;;  %v3651_v2 = vld [vmem:[#allocation2] sm:$0xff]  }
  0x45   :  { %3304 = vmatprep.subr.bf16.mxu0 %v3872_v0  ;;  %3308 = vmatprep.mubr.msk.bf16.mxu0 %vm3873_vm0, %v3872_v0  ;;  %s4610_s3 = sld [smem:[#allocation16_spill]]  ;;  %vm165_vm1 = vcmask 261120   ;;  %s3874_s27 = smov 96   ;;  %vm220_vm2 = vcmask 64512   ;;  %vm284_vm3 = vcmask 1043456   ;;  %vm1657_vm4 = vcmask 130048  }
  0x46   :  { %3312 = vmatprep.subr.bf16.mxu1 %v3872_v0  ;;  %3314 = vmatprep.mubr.msk.bf16.mxu1 %vm3873_vm0, %v3872_v0  ;;  %s4611_s26 = sld [smem:[#allocation19_spill]]  ;;  %s3875_s10 = smov 120   ;;  %v211_v59 = vld [vmem:[#allocation5 + $0x4] sm:$0xf]  ;;  %vm3006_vm5 = vcmask 523264  }
  0x47   :  { %3305 = vmatpush3.bf16.msra.mxu0 %v3650_v1  ;;  %s3876_s24 = smov 88   ;;  %s3877_s28 = smov 56   ;;  %v4099_v60 = vsel %vm284_vm3, %v211_v59, 0 }
  0x48   :  { %3306 = vmatprep.subr.bf16.mxu0 %v3872_v0  ;;  %s3878_s4 = smov 80   ;;  %s3879_s29 = smov 112  }
  0x49   :  { %s3880_s30 = smov 72   ;;  %s3881_s0 = smov 104  }
  0x4a   :  { %s3882_s21 = smov 48   ;;  %s3883_s8 = smov 40  }
  0x4b   :  { %v4031_v3 = vld [vmem:[%s4610_s3] sm:$0xff]  ;;  %v136_v4 = vld [vmem:[%s4610_s3 + $0x8] sm:$0xff]  ;;  %3307 = vmatpush3.bf16.msra.mxu0 %v3651_v2  ;;  %s4612_s23 = sld [smem:[#allocation17_spill]] }
  0x4c   :  { %v145_v5 = vpack.c.bf16 %v136_v4, %v4031_v3  ;;  %3318 = vmatprep.subr.bf16.mxu0 %v3872_v0  ;;  %v3118_v6 = vld [vmem:[%s4611_s26] ss:$0 sm:$0xff] }
  0x4e   :  { %3309 = vmatmul.mubr.msk.bf16.vlgmr.msra.gmra.mxu0 %vm165_vm1, %v145_v5 }
  0x4f   :  { %3320 = vmatprep.mubr.msk.bf16.mxu0 %vm3873_vm0, %v3872_v0 }
 0x10e   :  { %v203_v7 = vpop.f32.mrf.mxu0 }
 0x10f   :  { %v204_v8 = vadd.f32 %v3118_v6, %v203_v7 }
 0x110   :  { %v3310_v9 = vpop.f32.mrf.mxu0 }
 0x111   :  { %v214_v10 = vmul.f32 0.35355338, %v204_v8  ;;  %v4045_v11 = vpack.c.bf16 %v204_v8, %v204_v8 }
 0x112   :  { %v206_v12 = vpop.f32.mrf.mxu0 }
 0x113   :  { %v215_v13 = vpack.c.bf16 %v214_v10, %v214_v10  ;;  %v4047_v14 = vadd.f32 %v3118_v6, %v206_v12  ;;  %218 = vrot.lane.b32.xlu0 %v4045_v11, %s3874_s27 }
 0x114   :  { %v3311_v15 = vpop.f32.mrf.mxu0 }
 0x115   :  { %330 = vrot.lane.b32.xlu1 %v215_v13, %s3875_s10 }
 0x117   :  { %332 = vrot.lane.b32.xlu0 %v4045_v11, %s3876_s24 }
 0x185   :  { %v219_v16 = vpop.permute.xlu0 %218 }
 0x186   :  { %v225_v17 = vsel %vm220_vm2, %v219_v16, 0 }
 0x187   :  { %3313 = vmatpush3.bf16.xpose.msra.mxu1 %v225_v17  ;;  %v331_v20 = vpop.permute.xlu1 %330 }
 0x188   :  { %3324 = vmatprep.subr.bf16.mxu1 %v3872_v0 }
 0x189   :  { %v333_v18 = vpop.permute.xlu0 %332 }
 0x18a   :  { %v338_v19 = vsel %vm220_vm2, %v333_v18, 0 }
 0x18e   :  { %3315 = vmatmul.mubr.msk.bf16.vlgmr.msra.gmra.mxu1 %vm220_vm2, %v215_v13 }
 0x18f   :  { %3325 = vmatpush3.bf16.xpose.msra.mxu1 %v338_v19  ;;  %3326 = vmatprep.mubr.msk.bf16.mxu1 %vm3873_vm0, %v3872_v0 }
 0x190   :  { %3336 = vmatprep.subr.bf16.mxu1 %v3872_v0 }
 0x196   :  { %3327 = vmatmul.mubr.msk.bf16.vlgmr.msra.gmra.mxu1 %vm220_vm2, %v331_v20 }
 0x197   :  { %3338 = vmatprep.mubr.msk.bf16.mxu1 %vm3873_vm0, %v3872_v0  ;;  %3337 = vmatpush3.bf16.msra.mxu1 %v4099_v60 }
 0x198   :  { %3348 = vmatprep.subr.bf16.mxu1 %v3872_v0 }
 0x24e   :  { %v261_v21 = vpop.f32.mrf.mxu1 }
 0x24f   :  { %v267_v22 = vsel %vm220_vm2, %v261_v21, -inf }
 0x250   :  { %268 = vmax.xlane.f32.xlu1 %v267_v22  ;;  %v3316_v23 = vpop.f32.mrf.mxu1 }
 0x252   :  { %v264_v24 = vpop.f32.mrf.mxu1 }
 0x254   :  { %v3317_v25 = vpop.f32.mrf.mxu1 }
 0x256   :  { %v374_v26 = vpop.f32.mrf.mxu1 }
 0x257   :  { %v380_v27 = vsel %vm220_vm2, %v374_v26, -inf }
 0x258   :  { %381 = vmax.xlane.f32.xlu0 %v380_v27  ;;  %v3328_v28 = vpop.f32.mrf.mxu1 }
 0x25a   :  { %v377_v29 = vpop.f32.mrf.mxu1 }
 0x25c   :  { %v3329_v30 = vpop.f32.mrf.mxu1 }
 0x25d   :  { %v4116_v30 = vpack.c.bf16 %v4047_v14, %v4047_v14 }
 0x261   :  { %392 = vrot.lane.b32.xlu1 %v4045_v11, %s3877_s28 }
 0x2d9   :  { %v269_v31 = vpop.xlane.xlu1 %268 }
 0x2da   :  { %v270_v32 = vsub.f32 %v261_v21, %v269_v31  ;;  %v856_v31 = vmul.f32 0.35355338, %v4047_v14 }
 0x2dc   :  { %v271_v33 = vmul.f32 1.442695, %v270_v32 }
 0x2dd   :  { %v393_v42 = vpop.permute.xlu1 %392 }
 0x2de   :  { %3660 = vpow2.f32 %v271_v33  ;;  %v398_v49 = vsel %vm284_vm3, %v393_v42, 0 }
 0x2e1   :  { %v382_v34 = vpop.xlane.xlu0 %381 }
 0x2e2   :  { %v383_v35 = vsub.f32 %v374_v26, %v382_v34  ;;  %v4127_v34 = vpack.c.bf16 %v856_v31, %v856_v31 }
 0x2e4   :  { %v384_v36 = vmul.f32 1.442695, %v383_v35 }
 0x2e6   :  { %3662 = vpow2.f32 %v384_v36 }
 0x2eb   :  { %v3661_v37 = vpop.eup %3660 }
 0x2ec   :  { %v273_v38 = vsel %vm220_vm2, %v3661_v37, 0.0 }
 0x2ed   :  { %274 = vadd.xlane.f32.xlu0 %v273_v38 }
 0x2f3   :  { %v3663_v39 = vpop.eup %3662 }
 0x2f4   :  { %v386_v40 = vsel %vm220_vm2, %v3663_v39, 0.0 }
 0x2f5   :  { %387 = vadd.xlane.f32.xlu1 %v386_v40 }
 0x303   :  { %279 = vrot.lane.b32.xlu0 %v4045_v11, %s3867_s25 }
 0x306   :  { %489 = vrot.lane.b32.xlu1 %v4045_v11, %s3878_s4 }
 0x307   :  { %487 = vrot.lane.b32.xlu0 %v215_v13, %s3879_s29 }
 0x30a   :  { %600 = vrot.lane.b32.xlu1 %v4045_v11, %s3880_s30 }
 0x30b   :  { %598 = vrot.lane.b32.xlu0 %v215_v13, %s3881_s0 }
 0x376   :  { %v275_v41 = vpop.xlane.xlu0 %274 }
 0x377   :  { %3664 = vrcp.f32 %v275_v41 }
 0x37a   :  { %v280_v43 = vpop.permute.xlu0 %279 }
 0x37b   :  { %v286_v44 = vsel %vm284_vm3, %v280_v43, 0 }
 0x37c   :  { %3319 = vmatpush3.bf16.msra.mxu0 %v286_v44 }
 0x37d   :  { %3330 = vmatprep.subr.bf16.mxu0 %v3872_v0 }
 0x37e   :  { %v388_v45 = vpop.xlane.xlu1 %387  ;;  %v488_v56 = vpop.permute.xlu0 %487 }
 0x37f   :  { %3666 = vrcp.f32 %v388_v45  ;;  %v210_v45 = vld [vmem:[#allocation5] sm:$0xf] }
 0x382   :  { %v490_v52 = vpop.permute.xlu1 %489  ;;  %v599_v58 = vpop.permute.xlu0 %598 }
 0x383   :  { %v495_v54 = vsel %vm220_vm2, %v490_v52, 0 }
 0x384   :  { %v3665_v46 = vpop.eup %3664 }
 0x385   :  { %v277_v47 = vmul.f32 %v3665_v46, %v3661_v37 }
 0x386   :  { %v601_v55 = vpop.permute.xlu1 %600 }
 0x387   :  { %v278_v48 = vpack.c.bf16 %v277_v47, %v277_v47  ;;  %v606_v57 = vsel %vm220_vm2, %v601_v55, 0  ;;  %v213_v55 = vld [vmem:[#allocation5 + $0xc] sm:$0xf] }
 0x389   :  { %3321 = vmatmul.mubr.msk.bf16.vlgmr.msra.gmra.mxu0 %vm220_vm2, %v278_v48  ;;  %v4139_v48 = vsel %vm284_vm3, %v210_v45, 0 }
 0x38a   :  { %3331 = vmatpush3.bf16.msra.mxu0 %v398_v49  ;;  %3332 = vmatprep.mubr.msk.bf16.mxu0 %vm3873_vm0, %v3872_v0 }
 0x38b   :  { %3342 = vmatprep.subr.bf16.mxu0 %v3872_v0 }
 0x38c   :  { %v3667_v50 = vpop.eup %3666 }
 0x38d   :  { %v390_v51 = vmul.f32 %v3667_v50, %v3663_v39 }
 0x38f   :  { %v391_v53 = vpack.c.bf16 %v390_v51, %v390_v51 }
 0x391   :  { %3333 = vmatmul.mubr.msk.bf16.vlgmr.msra.gmra.mxu0 %vm220_vm2, %v391_v53 }
 0x392   :  { %3343 = vmatpush3.bf16.xpose.msra.mxu0 %v495_v54  ;;  %3344 = vmatprep.mubr.msk.bf16.mxu0 %vm3873_vm0, %v3872_v0 }
 0x393   :  { %3354 = vmatprep.subr.bf16.mxu0 %v3872_v0 }
 0x399   :  { %3345 = vmatmul.mubr.msk.bf16.vlgmr.msra.gmra.mxu0 %vm220_vm2, %v488_v56  ;;  %v4165_v56 = vsel %vm284_vm3, %v213_v55, 0 }
 0x39a   :  { %3355 = vmatpush3.bf16.xpose.msra.mxu0 %v606_v57  ;;  %3356 = vmatprep.mubr.msk.bf16.mxu0 %vm3873_vm0, %v3872_v0 }
 0x39b   :  { %3366 = vmatprep.subr.bf16.mxu0 %v3872_v0 }
 0x3a1   :  { %3357 = vmatmul.mubr.msk.bf16.vlgmr.msra.gmra.mxu0 %vm220_vm2, %v599_v58 }
 0x3a2   :  { %3368 = vmatprep.mubr.msk.bf16.mxu0 %vm3873_vm0, %v3872_v0  ;;  %3367 = vmatpush3.bf16.msra.mxu0 %v4165_v56 }
 0x3a3   :  { %3378 = vmatprep.subr.bf16.mxu0 %v3872_v0 }
 0x449   :  { %v4103_v61 = vpop.f32.mrf.mxu0 }
 0x44a   :  { %v328_v50 = vpack.c.bf16 %v4103_v61, %v4103_v61 }
 0x44b   :  { %v3322_v62 = vpop.f32.mrf.mxu0 }
 0x44c   :  { %v212_v62 = vld [vmem:[#allocation5 + $0x8] sm:$0xf] }
 0x44d   :  { %v325_v63 = vpop.f32.mrf.mxu0 }
 0x44f   :  { %v3323_v1 = vpop.f32.mrf.mxu0 }
 0x450   :  { %v4170_v1 = vsel %vm284_vm3, %v212_v62, 0 }
 0x451   :  { %v434_v2 = vpop.f32.mrf.mxu0 }
 0x452   :  { %v440_v4 = vpack.c.bf16 %v434_v2, %v434_v2 }
 0x453   :  { %v3334_v5 = vpop.f32.mrf.mxu0 }
 0x454   :  { %3339 = vmatmul.mubr.msk.bf16.vlgmr.msra.gmra.mxu1 %vm220_vm2, %v440_v4 }
 0x455   :  { %v437_v6 = vpop.f32.mrf.mxu0  ;;  %3350 = vmatprep.mubr.msk.bf16.mxu1 %vm3873_vm0, %v3872_v0 }
 0x457   :  { %v3335_v7 = vpop.f32.mrf.mxu0 }
 0x459   :  { %v531_v8 = vpop.f32.mrf.mxu0 }
 0x45a   :  { %v537_v9 = vsel %vm220_vm2, %v531_v8, -inf }
 0x45b   :  { %538 = vmax.xlane.f32.xlu1 %v537_v9  ;;  %v3346_v10 = vpop.f32.mrf.mxu0 }
 0x45d   :  { %v534_v12 = vpop.f32.mrf.mxu0 }
 0x45f   :  { %v3347_v13 = vpop.f32.mrf.mxu0 }
 0x461   :  { %v642_v15 = vpop.f32.mrf.mxu0 }
 0x462   :  { %v648_v16 = vsel %vm220_vm2, %v642_v15, -inf }
 0x463   :  { %649 = vmax.xlane.f32.xlu0 %v648_v16  ;;  %v3358_v17 = vpop.f32.mrf.mxu0 }
 0x465   :  { %v645_v18 = vpop.f32.mrf.mxu0 }
 0x467   :  { %v3359_v19 = vpop.f32.mrf.mxu0 }
 0x4e4   :  { %v539_v20 = vpop.xlane.xlu1 %538 }
 0x4e5   :  { %v540_v21 = vsub.f32 %v531_v8, %v539_v20 }
 0x4e7   :  { %v541_v22 = vmul.f32 1.442695, %v540_v21 }
 0x4e9   :  { %3668 = vpow2.f32 %v541_v22 }
 0x4ec   :  { %v650_v23 = vpop.xlane.xlu0 %649 }
 0x4ed   :  { %v651_v24 = vsub.f32 %v642_v15, %v650_v23 }
 0x4ef   :  { %v652_v25 = vmul.f32 1.442695, %v651_v24 }
 0x4f1   :  { %3670 = vpow2.f32 %v652_v25 }
 0x4f6   :  { %v3669_v26 = vpop.eup %3668 }
 0x4f7   :  { %v543_v27 = vsel %vm220_vm2, %v3669_v26, 0.0 }
 0x4f8   :  { %544 = vadd.xlane.f32.xlu0 %v543_v27 }
 0x4fe   :  { %v3671_v28 = vpop.eup %3670 }
 0x4ff   :  { %v654_v29 = vsel %vm220_vm2, %v3671_v28, 0.0 }
 0x500   :  { %655 = vadd.xlane.f32.xlu1 %v654_v29 }
 0x50e   :  { %549 = vrot.lane.b32.xlu0 %v4045_v11, %s3882_s21 }
 0x511   :  { %660 = vrot.lane.b32.xlu1 %v4045_v11, %s3883_s8 }
 0x512   :  { %972 = vrot.lane.b32.xlu0 %v4116_v30, %s3876_s24 }
 0x514   :  { %v4123_v32 = vpop.f32.mrf.mxu1 }
 0x515   :  { %860 = vrot.lane.b32.xlu1 %v4116_v30, %s3874_s27 }
 0x516   :  { %v3340_v33 = vpop.f32.mrf.mxu1 }
 0x518   :  { %v484_v35 = vpop.f32.mrf.mxu1 }
 0x519   :  { %970 = vrot.lane.b32.xlu1 %v4127_v34, %s3875_s10 }
 0x51a   :  { %v3341_v36 = vpop.f32.mrf.mxu1 }
 0x581   :  { %v545_v37 = vpop.xlane.xlu0 %544 }
 0x582   :  { %3672 = vrcp.f32 %v545_v37 }
 0x585   :  { %v550_v11 = vpop.permute.xlu0 %549 }
 0x586   :  { %v555_v38 = vsel %vm284_vm3, %v550_v11, 0 }
 0x587   :  { %3349 = vmatpush3.bf16.msra.mxu1 %v555_v38 }
 0x588   :  { %3360 = vmatprep.subr.bf16.mxu1 %v3872_v0 }
 0x589   :  { %v656_v14 = vpop.xlane.xlu1 %655  ;;  %v973_v52 = vpop.permute.xlu0 %972 }
 0x58a   :  { %3674 = vrcp.f32 %v656_v14  ;;  %v978_v53 = vsel %vm220_vm2, %v973_v52, 0 }
 0x58d   :  { %v661_v41 = vpop.permute.xlu1 %660 }
 0x58e   :  { %v666_v43 = vsel %vm284_vm3, %v661_v41, 0 }
 0x58f   :  { %v3673_v39 = vpop.eup %3672 }
 0x590   :  { %v547_v40 = vmul.f32 %v3673_v39, %v3669_v26 }
 0x591   :  { %v861_v49 = vpop.permute.xlu1 %860 }
 0x592   :  { %v548_v42 = vpack.c.bf16 %v547_v40, %v547_v40  ;;  %v866_v51 = vsel %vm220_vm2, %v861_v49, 0 }
 0x594   :  { %3351 = vmatmul.mubr.msk.bf16.vlgmr.msra.gmra.mxu1 %vm220_vm2, %v548_v42 }
 0x595   :  { %3361 = vmatpush3.bf16.msra.mxu1 %v666_v43  ;;  %3362 = vmatprep.mubr.msk.bf16.mxu1 %vm3873_vm0, %v3872_v0  ;;  %v971_v54 = vpop.permute.xlu1 %970 }
 0x596   :  { %3372 = vmatprep.subr.bf16.mxu1 %v3872_v0 }
 0x597   :  { %v3675_v44 = vpop.eup %3674 }
 0x598   :  { %v658_v46 = vmul.f32 %v3675_v44, %v3671_v28 }
 0x59a   :  { %v659_v47 = vpack.c.bf16 %v658_v46, %v658_v46 }
 0x59c   :  { %3363 = vmatmul.mubr.msk.bf16.vlgmr.msra.gmra.mxu1 %vm220_vm2, %v659_v47 }
 0x59d   :  { %3373 = vmatpush3.bf16.msra.mxu1 %v4139_v48  ;;  %3374 = vmatprep.mubr.msk.bf16.mxu1 %vm3873_vm0, %v3872_v0 }
 0x59e   :  { %3384 = vmatprep.subr.bf16.mxu1 %v3872_v0 }
 0x5a4   :  { %3375 = vmatmul.mubr.msk.bf16.vlgmr.msra.gmra.mxu1 %vm220_vm2, %v328_v50 }
 0x5a5   :  { %3385 = vmatpush3.bf16.xpose.msra.mxu1 %v866_v51  ;;  %3386 = vmatprep.mubr.msk.bf16.mxu1 %vm3873_vm0, %v3872_v0 }
 0x5a6   :  { %3396 = vmatprep.subr.bf16.mxu1 %v3872_v0 }
 0x5ac   :  { %3387 = vmatmul.mubr.msk.bf16.vlgmr.msra.gmra.mxu1 %vm220_vm2, %v4127_v34 }
 0x5ad   :  { %3397 = vmatpush3.bf16.xpose.msra.mxu1 %v978_v53  ;;  %3398 = vmatprep.mubr.msk.bf16.mxu1 %vm3873_vm0, %v3872_v0 }
 0x5ae   :  { %3408 = vmatprep.subr.bf16.mxu1 %v3872_v0 }
 0x5b4   :  { %3399 = vmatmul.mubr.msk.bf16.vlgmr.msra.gmra.mxu1 %vm220_vm2, %v971_v54 }
 0x5b5   :  { %3409 = vmatpush3.bf16.msra.mxu1 %v4099_v60  ;;  %3410 = vmatprep.mubr.msk.bf16.mxu1 %vm3873_vm0, %v3872_v0 }
 0x5b6   :  { %3420 = vmatprep.subr.bf16.mxu1 %v3872_v0 }
 0x654   :  { %v591_v57 = vpop.f32.mrf.mxu1 }
 0x655   :  { %v597_v7 = vpack.c.bf16 %v591_v57, %v591_v57 }
 0x656   :  { %v3352_v58 = vpop.f32.mrf.mxu1 }
 0x658   :  { %v594_v59 = vpop.f32.mrf.mxu1 }
 0x65a   :  { %v3353_v61 = vpop.f32.mrf.mxu1 }
 0x65c   :  { %v702_v63 = vpop.f32.mrf.mxu1 }
 0x65d   :  { %v708_v60 = vpack.c.bf16 %v702_v63, %v702_v63 }
 0x65e   :  { %v3364_v2 = vpop.f32.mrf.mxu1 }
 0x65f   :  { %3369 = vmatmul.mubr.msk.bf16.vlgmr.msra.gmra.mxu0 %vm220_vm2, %v708_v60 }
 0x660   :  { %v705_v4 = vpop.f32.mrf.mxu1  ;;  %3379 = vmatpush3.bf16.msra.mxu0 %v4170_v1  ;;  %3380 = vmatprep.mubr.msk.bf16.mxu0 %vm3873_vm0, %v3872_v0 }
 0x661   :  { %3390 = vmatprep.subr.bf16.mxu0 %v3872_v0 }
 0x662   :  { %v3365_v5 = vpop.f32.mrf.mxu1 }
 0x664   :  { %v795_v6 = vpop.f32.mrf.mxu1 }
 0x665   :  { %v796_v40 = vadd.f32 %v795_v6, %v4123_v32 }
 0x666   :  { %v3376_v8 = vpop.f32.mrf.mxu1 }
 0x667   :  { %3381 = vmatmul.mubr.msk.bf16.vlgmr.msra.gmra.mxu0 %vm220_vm2, %v597_v7 }
 0x668   :  { %v798_v9 = vpop.f32.mrf.mxu1  ;;  %3392 = vmatprep.mubr.msk.bf16.mxu0 %vm3873_vm0, %v3872_v0 }
 0x66a   :  { %v3377_v10 = vpop.f32.mrf.mxu1 }
 0x66c   :  { %v902_v12 = vpop.f32.mrf.mxu1 }
 0x66d   :  { %v908_v13 = vsel %vm220_vm2, %v902_v12, -inf }
 0x66e   :  { %909 = vmax.xlane.f32.xlu0 %v908_v13  ;;  %v3388_v15 = vpop.f32.mrf.mxu1 }
 0x670   :  { %v905_v16 = vpop.f32.mrf.mxu1 }
 0x672   :  { %v3389_v17 = vpop.f32.mrf.mxu1 }
 0x674   :  { %v1014_v18 = vpop.f32.mrf.mxu1 }
 0x675   :  { %v1020_v19 = vsel %vm220_vm2, %v1014_v18, -inf }
 0x676   :  { %1021 = vmax.xlane.f32.xlu1 %v1020_v19  ;;  %v3400_v20 = vpop.f32.mrf.mxu1 }
 0x678   :  { %v1017_v21 = vpop.f32.mrf.mxu1 }
 0x67a   :  { %v3401_v22 = vpop.f32.mrf.mxu1 }
 0x67b   :  { %v4233_v22 = vld [vmem:[%s4585_s5] ss:$0 sm:$0xff]  ;;  %s3884_s5 = smov [#allocation11]  }
 0x67c   :  { %s3104_s1 = sshll.u32 %s3884_s5, 4  ;;  %s3105_s1 = int_to_ptr.vmem [resolvable:$true] %s3104_s1 }
 0x67d   :  { %p3842_p12 = scmp.lt.s32.totalorder %s3105_s1, %s3105_s1 }
 0x687   :  { %920 = vrot.lane.b32.xlu1 %v4116_v30, %s3867_s25 }
 0x68b   :  { %1126 = vrot.lane.b32.xlu1 %v4116_v30, %s3878_s4 }
 0x68f   :  { %1124 = vrot.lane.b32.xlu1 %v4127_v34, %s3879_s29 }
 0x693   :  { %1235 = vrot.lane.b32.xlu1 %v4127_v34, %s3881_s0 }
 0x6f7   :  { %v910_v23 = vpop.xlane.xlu0 %909 }
 0x6f8   :  { %v911_v24 = vsub.f32 %v902_v12, %v910_v23 }
 0x6fa   :  { %v912_v25 = vmul.f32 1.442695, %v911_v24 }
 0x6fc   :  { %3676 = vpow2.f32 %v912_v25 }
 0x6ff   :  { %v1022_v26 = vpop.xlane.xlu1 %1021 }
 0x700   :  { %v1023_v27 = vsub.f32 %v1014_v18, %v1022_v26 }
 0x702   :  { %v1024_v28 = vmul.f32 1.442695, %v1023_v27 }
 0x703   :  { %v921_v29 = vpop.permute.xlu1 %920 }
 0x704   :  { %3678 = vpow2.f32 %v1024_v28  ;;  %v926_v31 = vsel %vm284_vm3, %v921_v29, 0 }
 0x705   :  { %3391 = vmatpush3.bf16.msra.mxu0 %v926_v31 }
 0x706   :  { %3402 = vmatprep.subr.bf16.mxu0 %v3872_v0 }
 0x707   :  { %v1127_v55 = vpop.permute.xlu1 %1126 }
 0x708   :  { %v1132_v58 = vsel %vm220_vm2, %v1127_v55, 0  ;;  %v3652_v55 = vld [vmem:[#allocation7 + $0x8] sm:$0xff]  }
 0x709   :  { %v3677_v33 = vpop.eup %3676 }
 0x70a   :  { %v914_v35 = vsel %vm220_vm2, %v3677_v33, 0.0 }
 0x70b   :  { %915 = vadd.xlane.f32.xlu0 %v914_v35  ;;  %v1125_v61 = vpop.permute.xlu1 %1124 }
 0x70f   :  { %v1236_v63 = vpop.permute.xlu1 %1235 }
 0x711   :  { %v3679_v36 = vpop.eup %3678 }
 0x712   :  { %v1026_v34 = vsel %vm220_vm2, %v3679_v36, 0.0 }
 0x713   :  { %1027 = vadd.xlane.f32.xlu0 %v1026_v34 }
 0x71f   :  { %v749_v37 = vpop.f32.mrf.mxu0 }
 0x721   :  { %v3370_v11 = vpop.f32.mrf.mxu0 }
 0x723   :  { %v752_v38 = vpop.f32.mrf.mxu0 }
 0x725   :  { %v3371_v14 = vpop.f32.mrf.mxu0 }
 0x727   :  { %v841_v39 = vpop.f32.mrf.mxu0 }
 0x728   :  { %v842_v41 = vadd.f32 %v841_v39, %v749_v37 }
 0x729   :  { %1032 = vrot.lane.b32.xlu0 %v4116_v30, %s3877_s28  ;;  %v3382_v42 = vpop.f32.mrf.mxu0 }
 0x72a   :  { %v4197_v43 = vadd.f32 %v842_v41, %v796_v40 }
 0x72b   :  { %v844_v44 = vpop.f32.mrf.mxu0 }
 0x72c   :  { %v855_v23 = vadd.f32 %v4233_v22, %v4197_v43 }
 0x72d   :  { %1237 = vrot.lane.b32.xlu0 %v4116_v30, %s3880_s30  ;;  %v3383_v45 = vpop.f32.mrf.mxu0 }
 0x72e   :  { %v1477_v24 = vadd.f32 %v855_v23, %v4031_v3 }
 0x730   :  { %v1479_v25 = vsel %vm165_vm1, %v1477_v24, 0.0 }
 0x794   :  { %v916_v46 = vpop.xlane.xlu0 %915 }
 0x795   :  { %3680 = vrcp.f32 %v916_v46 }
 0x79c   :  { %v1028_v47 = vpop.xlane.xlu0 %1027 }
 0x79d   :  { %3682 = vrcp.f32 %v1028_v47 }
 0x7a0   :  { %v1033_v51 = vpop.permute.xlu0 %1032 }
 0x7a1   :  { %v1038_v52 = vsel %vm284_vm3, %v1033_v51, 0 }
 0x7a2   :  { %v3681_v49 = vpop.eup %3680 }
 0x7a3   :  { %v918_v50 = vmul.f32 %v3681_v49, %v3677_v33 }
 0x7a4   :  { %v1238_v59 = vpop.permute.xlu0 %1237 }
 0x7a5   :  { %v919_v32 = vpack.c.bf16 %v918_v50, %v918_v50  ;;  %v1243_v62 = vsel %vm220_vm2, %v1238_v59, 0 }
 0x7a7   :  { %3393 = vmatmul.mubr.msk.bf16.vlgmr.msra.gmra.mxu0 %vm220_vm2, %v919_v32 }
 0x7a8   :  { %3403 = vmatpush3.bf16.msra.mxu0 %v1038_v52  ;;  %3404 = vmatprep.mubr.msk.bf16.mxu0 %vm3873_vm0, %v3872_v0 }
 0x7a9   :  { %3414 = vmatprep.subr.bf16.mxu0 %v3872_v0 }
 0x7aa   :  { %v3683_v53 = vpop.eup %3682 }
 0x7ab   :  { %v1030_v54 = vmul.f32 %v3683_v53, %v3679_v36 }
 0x7ad   :  { %v1031_v57 = vpack.c.bf16 %v1030_v54, %v1030_v54 }
 0x7af   :  { %3405 = vmatmul.mubr.msk.bf16.vlgmr.msra.gmra.mxu0 %vm220_vm2, %v1031_v57  ;;  %v137_v57 = vld [vmem:[%s4612_s23] sm:$0xff] }
 0x7b0   :  { %3415 = vmatpush3.bf16.xpose.msra.mxu0 %v1132_v58  ;;  %3416 = vmatprep.mubr.msk.bf16.mxu0 %vm3873_vm0, %v3872_v0  ;;  %v138_v58 = vld [vmem:[%s4612_s23 + $0x8] sm:$0xff] }
 0x7b1   :  { %3426 = vmatprep.subr.bf16.mxu0 %v3872_v0  ;;  %v1528_v59 = vpack.c.bf16 %v138_v58, %v137_v57 }
 0x7b7   :  { %3417 = vmatmul.mubr.msk.bf16.vlgmr.msra.gmra.mxu0 %vm220_vm2, %v1125_v61 }
 0x7b8   :  { %3427 = vmatpush3.bf16.xpose.msra.mxu0 %v1243_v62  ;;  %3428 = vmatprep.mubr.msk.bf16.mxu0 %vm3873_vm0, %v3872_v0  ;;  %v3653_v62 = vld [vmem:[#allocation7] sm:$0xff]  }
 0x7b9   :  { %3438 = vmatprep.subr.bf16.mxu0 %v3872_v0 }
 0x7bf   :  { %3429 = vmatmul.mubr.msk.bf16.vlgmr.msra.gmra.mxu0 %vm220_vm2, %v1236_v63  ;;  %v140_v63 = vld [vmem:[%s4612_s23 + $0x18] sm:$0xff] }
 0x7c0   :  { %3439 = vmatpush3.bf16.msra.mxu0 %v4165_v56  ;;  %3440 = vmatprep.mubr.msk.bf16.mxu0 %vm3873_vm0, %v3872_v0 }
 0x7c1   :  { %3450 = vmatprep.subr.bf16.mxu0 %v3872_v0 }
 0x867   :  { %v4221_v60 = vpop.f32.mrf.mxu0 }
 0x868   :  { %v968_v61 = vpack.c.bf16 %v4221_v60, %v4221_v60 }
 0x869   :  { %v3394_v2 = vpop.f32.mrf.mxu0 }
 0x86b   :  { %v965_v4 = vpop.f32.mrf.mxu0 }
 0x86d   :  { %v3395_v5 = vpop.f32.mrf.mxu0 }
 0x86f   :  { %v1074_v6 = vpop.f32.mrf.mxu0 }
 0x870   :  { %v1080_v7 = vpack.c.bf16 %v1074_v6, %v1074_v6 }
 0x871   :  { %v3406_v8 = vpop.f32.mrf.mxu0 }
 0x872   :  { %3411 = vmatmul.mubr.msk.bf16.vlgmr.msra.gmra.mxu1 %vm220_vm2, %v1080_v7  ;;  %v4280_v7 = vld [vmem:[%s4586_s6] ss:$0 sm:$0xff]  ;;  %s3837_s6 = scalar_lea.vmem %s3105_s1, 256 }
 0x873   :  { %v1077_v9 = vpop.f32.mrf.mxu0  ;;  %3422 = vmatprep.mubr.msk.bf16.mxu1 %vm3873_vm0, %v3872_v0  ;;  %p3838_p11 = scmp.ne.s32.totalorder %s3105_s1, %s3837_s6  ;;  %p3843_p13 = scmp.lt.s32.totalorder %s3837_s6, %s3837_s6 }
 0x874   :  { %v4285_v9 = vld [vmem:[%s4587_s7] ss:$0 sm:$0xff] }
 0x875   :  { %v3407_v56 = vpop.f32.mrf.mxu0  ;;  %p3844_p0 = por %p3843_p13, %p3842_p12 }
 0x877   :  { %v1168_v10 = vpop.f32.mrf.mxu0  ;;  %p3845_p1 = pnand %p3844_p0, %p3838_p11 }
 0x878   :  { %v1174_v12 = vsel %vm220_vm2, %v1168_v10, -inf }
 0x879   :  { %1175 = vmax.xlane.f32.xlu0 %v1174_v12  ;;  %v3418_v13 = vpop.f32.mrf.mxu0 }
 0x87b   :  { %v1171_v15 = vpop.f32.mrf.mxu0 }
 0x87d   :  { %v3419_v16 = vpop.f32.mrf.mxu0 }
 0x87f   :  { %v1279_v17 = vpop.f32.mrf.mxu0 }
 0x880   :  { %v1285_v18 = vsel %vm220_vm2, %v1279_v17, -inf }
 0x881   :  { %1286 = vmax.xlane.f32.xlu1 %v1285_v18  ;;  %v3430_v19 = vpop.f32.mrf.mxu0 }
 0x883   :  { %v1282_v20 = vpop.f32.mrf.mxu0 }
 0x885   :  { %v3431_v21 = vpop.f32.mrf.mxu0 }
 0x892   :  { %1186 = vrot.lane.b32.xlu1 %v4116_v30, %s3882_s21 }
 0x8b6   :  { %1480 = vadd.xlane.f32.xlu1 %v1479_v25 }
 0x902   :  { %v1176_v26 = vpop.xlane.xlu0 %1175 }
 0x903   :  { %v1177_v27 = vsub.f32 %v1168_v10, %v1176_v26 }
 0x905   :  { %v1178_v28 = vmul.f32 1.442695, %v1177_v27 }
 0x907   :  { %3684 = vpow2.f32 %v1178_v28 }
 0x90a   :  { %v1287_v29 = vpop.xlane.xlu1 %1286 }
 0x90b   :  { %v1288_v31 = vsub.f32 %v1279_v17, %v1287_v29 }
 0x90d   :  { %v1289_v33 = vmul.f32 1.442695, %v1288_v31 }
 0x90e   :  { %v1187_v35 = vpop.permute.xlu1 %1186 }
 0x90f   :  { %3686 = vpow2.f32 %v1289_v33  ;;  %v1192_v36 = vsel %vm284_vm3, %v1187_v35, 0 }
 0x910   :  { %3421 = vmatpush3.bf16.msra.mxu1 %v1192_v36 }
 0x911   :  { %3432 = vmatprep.subr.bf16.mxu1 %v3872_v0 }
 0x914   :  { %v3685_v34 = vpop.eup %3684 }
 0x915   :  { %v1180_v3 = vsel %vm220_vm2, %v3685_v34, 0.0 }
 0x916   :  { %1181 = vadd.xlane.f32.xlu0 %v1180_v3 }
 0x91c   :  { %v3687_v37 = vpop.eup %3686 }
 0x91d   :  { %v1291_v11 = vsel %vm220_vm2, %v3687_v37, 0.0 }
 0x91e   :  { %1292 = vadd.xlane.f32.xlu0 %v1291_v11 }
 0x932   :  { %v4243_v38 = vpop.f32.mrf.mxu1 }
 0x934   :  { %v3412_v14 = vpop.f32.mrf.mxu1  ;;  %1297 = vrot.lane.b32.xlu0 %v4116_v30, %s3883_s8 }
 0x936   :  { %v1121_v39 = vpop.f32.mrf.mxu1 }
 0x938   :  { %v3413_v40 = vpop.f32.mrf.mxu1 }
 0x93f   :  { %v1481_v41 = vpop.xlane.xlu1 %1480 }
 0x940   :  { %v1486_v42 = vmul.f32 0.03125, %v1481_v41 }
 0x942   :  { %v1488_v43 = vsub.f32 %v1477_v24, %v1486_v42 }
 0x944   :  { %v1490_v44 = vmul.f32 %v1488_v43, %v1488_v43 }
 0x946   :  { %v1492_v45 = vsel %vm165_vm1, %v1490_v44, 0.0 }
 0x953   :  { %1493 = vadd.xlane.f32.xlu0 %v1492_v45 }
 0x99f   :  { %v1182_v46 = vpop.xlane.xlu0 %1181 }
 0x9a0   :  { %3688 = vrcp.f32 %v1182_v46 }
 0x9a7   :  { %v1293_v47 = vpop.xlane.xlu0 %1292 }
 0x9a8   :  { %3690 = vrcp.f32 %v1293_v47 }
 0x9ab   :  { %v1298_v51 = vpop.permute.xlu0 %1297 }
 0x9ac   :  { %v1303_v52 = vsel %vm284_vm3, %v1298_v51, 0 }
 0x9ad   :  { %v3689_v49 = vpop.eup %3688 }
 0x9ae   :  { %v1184_v50 = vmul.f32 %v3689_v49, %v3685_v34 }
 0x9b0   :  { %v1185_v32 = vpack.c.bf16 %v1184_v50, %v1184_v50 }
 0x9b2   :  { %3423 = vmatmul.mubr.msk.bf16.vlgmr.msra.gmra.mxu1 %vm220_vm2, %v1185_v32 }
 0x9b3   :  { %3433 = vmatpush3.bf16.msra.mxu1 %v1303_v52  ;;  %3434 = vmatprep.mubr.msk.bf16.mxu1 %vm3873_vm0, %v3872_v0 }
 0x9b4   :  { %3444 = vmatprep.subr.bf16.mxu1 %v3872_v0 }
 0x9b5   :  { %v3691_v30 = vpop.eup %3690 }
 0x9b6   :  { %v1295_v53 = vmul.f32 %v3691_v30, %v3687_v37 }
 0x9b8   :  { %v1296_v54 = vpack.c.bf16 %v1295_v53, %v1295_v53 }
 0x9ba   :  { %3435 = vmatmul.mubr.msk.bf16.vlgmr.msra.gmra.mxu1 %vm220_vm2, %v1296_v54 }
 0x9bb   :  { %3445 = vmatpush3.bf16.msra.mxu1 %v4139_v48  ;;  %3446 = vmatprep.mubr.msk.bf16.mxu1 %vm3873_vm0, %v3872_v0  ;;  %v139_v48 = vld [vmem:[%s4612_s23 + $0x10] sm:$0xff] }
 0x9bc   :  { %3456 = vmatprep.subr.bf16.mxu1 %v3652_v55  ;;  %v1529_v2 = vpack.c.bf16 %v140_v63, %v139_v48 }
 0x9c2   :  { %3447 = vmatmul.mubr.msk.bf16.vlgmr.msra.gmra.mxu1 %vm220_vm2, %v968_v61 }
 0x9c3   :  { %3457 = vmatpush3.bf16.msra.mxu1 %v3652_v55  ;;  %3460 = vmatprep.mubr.msk.bf16.mxu1 %vm165_vm1, %v1528_v59 }
 0x9c4   :  { %3458 = vmatprep.subr.bf16.mxu1 %v3653_v62 }
 0x9c7   :  { %3459 = vmatpush3.bf16.msra.mxu1 %v3653_v62 }
 0x9c8   :  { %3470 = vmatprep.subr.bf16.mxu1 %v3872_v0 }
 0x9ca   :  { %3461 = vmatmul.mubr.msk.bf16.vlgmr.msra.gmra.mxu1 %vm165_vm1, %v1529_v2 }
 0x9cb   :  { %3472 = vmatprep.mubr.msk.bf16.mxu1 %vm3873_vm0, %v3872_v0 }
 0x9dc   :  { %v1494_v60 = vpop.xlane.xlu0 %1493 }
 0x9dd   :  { %v1498_v4 = vmul.f32 0.03125, %v1494_v60 }
 0x9df   :  { %v1500_v5 = vadd.f32 1e-05, %v1498_v4 }
 0x9e1   :  { %3692 = vrsqrt.f32 %v1500_v5 }
 0x9ee   :  { %v3693_v6 = vpop.eup %3692 }
 0x9ef   :  { %v1504_v8 = vmul.f32 %v3693_v6, %v1488_v43 }
 0x9f1   :  { %v1513_v56 = vmul.f32 %v4280_v7, %v1504_v8 }
 0x9f3   :  { %v4289_v10 = vadd.f32 %v4285_v9, %v1513_v56 }
 0x9f5   :  { %v1608_v12 = vmul.f32 0.35355338, %v4289_v10 }
 0x9f7   :  { %v4292_v13 = vpack.c.bf16 %v1608_v12, %v1608_v12 }
 0x9f9   :  { %1719 = vrot.lane.b32.xlu0 %v4292_v13, %s3875_s10 }
 0xa6b   :  { %v1720_v43 = vpop.permute.xlu0 %1719 }
 0xa72   :  { %v1228_v15 = vpop.f32.mrf.mxu1 }
 0xa73   :  { %v1234_v26 = vpack.c.bf16 %v1228_v15, %v1228_v15 }
 0xa74   :  { %v3424_v16 = vpop.f32.mrf.mxu1 }
 0xa76   :  { %v1231_v17 = vpop.f32.mrf.mxu1 }
 0xa78   :  { %v3425_v18 = vpop.f32.mrf.mxu1 }
 0xa7a   :  { %v1339_v19 = vpop.f32.mrf.mxu1 }
 0xa7b   :  { %v1345_v20 = vpack.c.bf16 %v1339_v19, %v1339_v19 }
 0xa7c   :  { %v3436_v21 = vpop.f32.mrf.mxu1 }
 0xa7d   :  { %3441 = vmatmul.mubr.msk.bf16.vlgmr.msra.gmra.mxu0 %vm220_vm2, %v1345_v20 }
 0xa7e   :  { %v1342_v23 = vpop.f32.mrf.mxu1  ;;  %3451 = vmatpush3.bf16.msra.mxu0 %v4170_v1  ;;  %3452 = vmatprep.mubr.msk.bf16.mxu0 %vm3873_vm0, %v3872_v0  ;;  %v3149_v1 = vld [vmem:[%s4589_s9] ss:$0 sm:$0xff] }
 0xa7f   :  { %3464 = vmatprep.subr.bf16.mxu0 %v3872_v0  ;;  %v3736_v23 = vld [vmem:[%s4610_s3 + $0x8] sm:$0xff] }
 0xa80   :  { %v3437_v24 = vpop.f32.mrf.mxu1 }
 0xa82   :  { %v1426_v25 = vpop.f32.mrf.mxu1 }
 0xa83   :  { %v1427_v50 = vadd.f32 %v1426_v25, %v4243_v38 }
 0xa84   :  { %v3448_v27 = vpop.f32.mrf.mxu1 }
 0xa85   :  { %3453 = vmatmul.mubr.msk.bf16.vlgmr.msra.gmra.mxu0 %vm220_vm2, %v1234_v26 }
 0xa86   :  { %v1429_v28 = vpop.f32.mrf.mxu1  ;;  %3466 = vmatprep.mubr.msk.bf16.mxu0 %vm3873_vm0, %v3872_v0 }
 0xa88   :  { %v3449_v29 = vpop.f32.mrf.mxu1 }
 0xa8a   :  { %v3462_v31 = vpop.f32.mrf.mxu1 }
 0xa8b   :  { %v1598_v33 = vadd.f32 %v3462_v31, %v3149_v1 }
 0xa8c   :  { %v1589_v35 = vpop.f32.mrf.mxu1 }
 0xa8d   :  { %v1590_v37 = vadd.f32 %v3149_v1, %v1589_v35 }
 0xa8e   :  { %v3463_v36 = vpop.f32.mrf.mxu1 }
 0xa8f   :  { %v1601_v34 = vadd.f32 %v3463_v36, %v3149_v1 }
 0xa90   :  { %v1592_v3 = vpop.f32.mrf.mxu1 }
 0xa91   :  { %v4307_v11 = vpack.c.bf16 %v1601_v34, %v1598_v33  ;;  %v1593_v14 = vadd.f32 %v3149_v1, %v1592_v3  ;;  %v1605_v3 = vld [vmem:[#allocation8 + $0x4] sm:$0xf] }
 0xa93   :  { %v4309_v39 = vpack.c.bf16 %v1593_v14, %v1590_v37  ;;  %v4366_v37 = vsel %vm284_vm3, %v1605_v3, 0 }
 0xa95   :  { %1721 = vrot.lane.b32.xlu1 %v4309_v39, %s3875_s10  ;;  %v1615_v40 = vsel %vm220_vm2, %v4309_v39, 0 }
 0xa96   :  { %3465 = vmatpush3.bf16.xpose.msra.mxu0 %v1615_v40 }
 0xa97   :  { %3476 = vmatprep.subr.bf16.mxu0 %v3872_v0 }
 0xa9d   :  { %3467 = vmatmul.mubr.msk.bf16.vlgmr.msra.gmra.mxu0 %vm220_vm2, %v4292_v13 }
 0xa9e   :  { %3478 = vmatprep.mubr.msk.bf16.mxu0 %vm3873_vm0, %v3872_v0 }
 0xb07   :  { %v1722_v41 = vpop.permute.xlu1 %1721 }
 0xb08   :  { %v1727_v42 = vsel %vm220_vm2, %v1722_v41, 0 }
 0xb09   :  { %3477 = vmatpush3.bf16.xpose.msra.mxu0 %v1727_v42 }
 0xb0a   :  { %3488 = vmatprep.subr.bf16.mxu0 %v3872_v0 }
 0xb10   :  { %3479 = vmatmul.mubr.msk.bf16.vlgmr.msra.gmra.mxu0 %vm220_vm2, %v1720_v43 }
 0xb11   :  { %3490 = vmatprep.mubr.msk.bf16.mxu0 %vm3873_vm0, %v3872_v0  ;;  %3489 = vmatpush3.bf16.msra.mxu0 %v4366_v37 }
 0xb12   :  { %3500 = vmatprep.subr.bf16.mxu0 %v3872_v0 }
 0xb3d   :  { %v1383_v44 = vpop.f32.mrf.mxu0 }
 0xb3f   :  { %v3442_v45 = vpop.f32.mrf.mxu0 }
 0xb41   :  { %v1386_v46 = vpop.f32.mrf.mxu0 }
 0xb43   :  { %v3443_v47 = vpop.f32.mrf.mxu0 }
 0xb45   :  { %v1469_v49 = vpop.f32.mrf.mxu0 }
 0xb46   :  { %v1470_v51 = vadd.f32 %v1469_v49, %v1383_v44 }
 0xb47   :  { %v3454_v32 = vpop.f32.mrf.mxu0 }
 0xb48   :  { %v1475_v52 = vadd.f32 %v1470_v51, %v1427_v50 }
 0xb49   :  { %v1472_v30 = vpop.f32.mrf.mxu0 }
 0xb4a   :  { %v1476_v21 = vadd.f32 %v4233_v22, %v1475_v52 }
 0xb4b   :  { %v3455_v53 = vpop.f32.mrf.mxu0 }
 0xb4c   :  { %v1478_v24 = vadd.f32 %v3736_v23, %v1476_v21 }
 0xb4e   :  { %v1482_v25 = vsel %vm165_vm1, %v1478_v24, 0.0 }
 0xb5d   :  { %v1651_v54 = vpop.f32.mrf.mxu0 }
 0xb5e   :  { %v1658_v55 = vsel %vm1657_vm4, %v1651_v54, -inf }
 0xb5f   :  { %1659 = vmax.xlane.f32.xlu1 %v1658_v55  ;;  %v3468_v57 = vpop.f32.mrf.mxu0 }
 0xb61   :  { %v1654_v58 = vpop.f32.mrf.mxu0 }
 0xb63   :  { %v3469_v59 = vpop.f32.mrf.mxu0 }
 0xbd0   :  { %v1763_v61 = vpop.f32.mrf.mxu0 }
 0xbd1   :  { %v1769_v62 = vsel %vm1657_vm4, %v1763_v61, -inf }
 0xbd2   :  { %1770 = vmax.xlane.f32.xlu0 %v1769_v62  ;;  %v3480_v48 = vpop.f32.mrf.mxu0 }
 0xbd4   :  { %v1766_v63 = vpop.f32.mrf.mxu0 }
 0xbd6   :  { %v3481_v38 = vpop.f32.mrf.mxu0 }
 0xbe8   :  { %v1660_v2 = vpop.xlane.xlu1 %1659 }
 0xbe9   :  { %v1661_v60 = vsub.f32 %v1651_v54, %v1660_v2 }
 0xbeb   :  { %v1662_v4 = vmul.f32 1.442695, %v1661_v60 }
 0xbed   :  { %3694 = vpow2.f32 %v1662_v4 }
 0xbfa   :  { %v3695_v5 = vpop.eup %3694 }
 0xbfb   :  { %v1664_v6 = vsel %vm1657_vm4, %v3695_v5, 0.0 }
 0xbfc   :  { %1665 = vadd.xlane.f32.xlu1 %v1664_v6 }
 0xc0d   :  { %1671 = vrot.lane.b32.xlu1 %v4309_v39, %s3874_s27 }
 0xc11   :  { %1876 = vrot.lane.b32.xlu1 %v4309_v39, %s3879_s29 }
 0xc15   :  { %1874 = vrot.lane.b32.xlu1 %v4292_v13, %s3879_s29 }
 0xc19   :  { %1983 = vrot.lane.b32.xlu1 %v4292_v13, %s3881_s0 }
 0xc5b   :  { %v1771_v8 = vpop.xlane.xlu0 %1770 }
 0xc5c   :  { %v1772_v56 = vsub.f32 %v1763_v61, %v1771_v8 }
 0xc5e   :  { %v1773_v12 = vmul.f32 1.442695, %v1772_v56 }
 0xc60   :  { %3696 = vpow2.f32 %v1773_v12 }
 0xc6d   :  { %v3697_v15 = vpop.eup %3696 }
 0xc6e   :  { %v1775_v16 = vsel %vm1657_vm4, %v3697_v15, 0.0 }
 0xc6f   :  { %1776 = vadd.xlane.f32.xlu0 %v1775_v16 }
 0xc85   :  { %v1666_v17 = vpop.xlane.xlu1 %1665  ;;  %1781 = vrot.lane.b32.xlu0 %v4309_v39, %s3876_s24 }
 0xc86   :  { %3698 = vrcp.f32 %v1666_v17 }
 0xc89   :  { %v1672_v18 = vpop.permute.xlu1 %1671  ;;  %1985 = vrot.lane.b32.xlu0 %v4309_v39, %s3881_s0 }
 0xc8a   :  { %3471 = vmatpush3.bf16.msra.mxu1 %v1672_v18 }
 0xc8b   :  { %3482 = vmatprep.subr.bf16.mxu1 %v3872_v0 }
 0xc8d   :  { %v1877_v1 = vpop.permute.xlu1 %1876 }
 0xc8e   :  { %v1882_v22 = vsel %vm220_vm2, %v1877_v1, 0 }
 0xc91   :  { %v1875_v35 = vpop.permute.xlu1 %1874 }
 0xc93   :  { %v3699_v13 = vpop.eup %3698 }
 0xc94   :  { %v1668_v19 = vmul.f32 %v3699_v13, %v3695_v5 }
 0xc95   :  { %v1984_v34 = vpop.permute.xlu1 %1983 }
 0xc96   :  { %v1669_v20 = vpack.c.bf16 %v1668_v19, %v1668_v19 }
 0xc98   :  { %3473 = vmatmul.mubr.msk.bf16.vlgmr.msra.gmra.mxu1 %vm1657_vm4, %v1669_v20 }
 0xc99   :  { %3484 = vmatprep.mubr.msk.bf16.mxu1 %vm3873_vm0, %v3872_v0 }
 0xca8   :  { %1483 = vadd.xlane.f32.xlu0 %v1482_v25 }
 0xcf8   :  { %v1777_v26 = vpop.xlane.xlu0 %1776 }
 0xcf9   :  { %3700 = vrcp.f32 %v1777_v26 }
 0xcfc   :  { %v1782_v27 = vpop.permute.xlu0 %1781 }
 0xcfd   :  { %3483 = vmatpush3.bf16.msra.mxu1 %v1782_v27 }
 0xcfe   :  { %3494 = vmatprep.subr.bf16.mxu1 %v3872_v0 }
 0xd00   :  { %v1986_v33 = vpop.permute.xlu0 %1985 }
 0xd01   :  { %v1991_v36 = vsel %vm220_vm2, %v1986_v33, 0  ;;  %v1604_v33 = vld [vmem:[#allocation8] sm:$0xf] }
 0xd06   :  { %v3701_v28 = vpop.eup %3700 }
 0xd07   :  { %v1779_v29 = vmul.f32 %v3701_v28, %v3697_v15 }
 0xd09   :  { %v1780_v31 = vpack.c.bf16 %v1779_v29, %v1779_v29 }
 0xd0b   :  { %3485 = vmatmul.mubr.msk.bf16.vlgmr.msra.gmra.mxu1 %vm1657_vm4, %v1780_v31 }
 0xd0c   :  { %3495 = vmatpush3.bf16.xpose.msra.mxu1 %v1882_v22  ;;  %3496 = vmatprep.mubr.msk.bf16.mxu1 %vm3873_vm0, %v3872_v0 }
 0xd0d   :  { %3506 = vmatprep.subr.bf16.mxu1 %v3872_v0 }
 0xd13   :  { %3497 = vmatmul.mubr.msk.bf16.vlgmr.msra.gmra.mxu1 %vm220_vm2, %v1875_v35 }
 0xd14   :  { %3507 = vmatpush3.bf16.xpose.msra.mxu1 %v1991_v36  ;;  %3508 = vmatprep.mubr.msk.bf16.mxu1 %vm3873_vm0, %v3872_v0 }
 0xd15   :  { %3518 = vmatprep.subr.bf16.mxu1 %v3872_v0 }
 0xd1b   :  { %3509 = vmatmul.mubr.msk.bf16.vlgmr.msra.gmra.mxu1 %vm220_vm2, %v1984_v34  ;;  %v4403_v34 = vsel %vm284_vm3, %v1604_v33, 0 }
 0xd1c   :  { %3520 = vmatprep.mubr.msk.bf16.mxu1 %vm3873_vm0, %v3872_v0 }
 0xd31   :  { %v1484_v47 = vpop.xlane.xlu0 %1483 }
 0xd32   :  { %v1487_v51 = vmul.f32 0.03125, %v1484_v47 }
 0xd34   :  { %v1489_v53 = vsub.f32 %v1478_v24, %v1487_v51 }
 0xd36   :  { %v1491_v58 = vmul.f32 %v1489_v53, %v1489_v53 }
 0xd38   :  { %v1495_v62 = vsel %vm165_vm1, %v1491_v58, 0.0 }
 0xd58   :  { %v4370_v14 = vpop.f32.mrf.mxu1 }
 0xd59   :  { %v1717_v3 = vpack.c.bf16 %v4370_v14, %v4370_v14 }
 0xd5a   :  { %v3474_v40 = vpop.f32.mrf.mxu1 }
 0xd5b   :  { %v2246_v40 = vsel %vm220_vm2, %v4307_v11, 0 }
 0xd5c   :  { %v1714_v41 = vpop.f32.mrf.mxu1 }
 0xd5e   :  { %v3475_v42 = vpop.f32.mrf.mxu1 }
 0xdcb   :  { %v1821_v43 = vpop.f32.mrf.mxu1 }
 0xdcc   :  { %v1827_v44 = vpack.c.bf16 %v1821_v43, %v1821_v43  ;;  %v1607_v43 = vld [vmem:[#allocation8 + $0xc] sm:$0xf] }
 0xdcd   :  { %v3486_v45 = vpop.f32.mrf.mxu1 }
 0xdce   :  { %3491 = vmatmul.mubr.msk.bf16.vlgmr.msra.gmra.mxu0 %vm220_vm2, %v1827_v44  ;;  %v4430_v44 = vsel %vm284_vm3, %v1607_v43, 0 }
 0xdcf   :  { %v1824_v46 = vpop.f32.mrf.mxu1  ;;  %3502 = vmatprep.mubr.msk.bf16.mxu0 %vm3873_vm0, %v3872_v0  ;;  %3519 = vmatpush3.bf16.msra.mxu1 %v4430_v44 }
 0xdd0   :  { %3530 = vmatprep.subr.bf16.mxu1 %v3872_v0 }
 0xdd1   :  { %v3487_v49 = vpop.f32.mrf.mxu1 }
 0xdd3   :  { %v1918_v50 = vpop.f32.mrf.mxu1 }
 0xdd4   :  { %v1924_v32 = vsel %vm1657_vm4, %v1918_v50, -inf }
 0xdd5   :  { %1925 = vmax.xlane.f32.xlu1 %v1924_v32  ;;  %v3498_v52 = vpop.f32.mrf.mxu1 }
 0xdd7   :  { %v1921_v30 = vpop.f32.mrf.mxu1 }
 0xdd9   :  { %v3499_v54 = vpop.f32.mrf.mxu1 }
 0xddb   :  { %v2027_v55 = vpop.f32.mrf.mxu1 }
 0xddc   :  { %v2033_v57 = vsel %vm1657_vm4, %v2027_v55, -inf }
 0xddd   :  { %2034 = vmax.xlane.f32.xlu0 %v2033_v57  ;;  %v3510_v59 = vpop.f32.mrf.mxu1 }
 0xddf   :  { %v2030_v61 = vpop.f32.mrf.mxu1 }
 0xde1   :  { %v3511_v48 = vpop.f32.mrf.mxu1  ;;  %1496 = vadd.xlane.f32.xlu0 %v1495_v62 }
 0xe5e   :  { %v1926_v63 = vpop.xlane.xlu1 %1925 }
 0xe5f   :  { %v1927_v38 = vsub.f32 %v1918_v50, %v1926_v63  ;;  %v1606_v50 = vld [vmem:[#allocation8 + $0x8] sm:$0xf] }
 0xe60   :  { %v4435_v32 = vsel %vm284_vm3, %v1606_v50, 0 }
 0xe61   :  { %v1928_v2 = vmul.f32 1.442695, %v1927_v38 }
 0xe63   :  { %3702 = vpow2.f32 %v1928_v2 }
 0xe66   :  { %v2035_v60 = vpop.xlane.xlu0 %2034 }
 0xe67   :  { %v2036_v4 = vsub.f32 %v2027_v55, %v2035_v60 }
 0xe69   :  { %v2037_v5 = vmul.f32 1.442695, %v2036_v4 }
 0xe6a   :  { %v1497_v6 = vpop.xlane.xlu0 %1496 }
 0xe6b   :  { %3704 = vpow2.f32 %v2037_v5  ;;  %v1499_v8 = vmul.f32 0.03125, %v1497_v6 }
 0xe6d   :  { %v1501_v56 = vadd.f32 1e-05, %v1499_v8 }
 0xe6f   :  { %3706 = vrsqrt.f32 %v1501_v56 }
 0xe70   :  { %v3703_v12 = vpop.eup %3702 }
 0xe71   :  { %v1930_v15 = vsel %vm1657_vm4, %v3703_v12, 0.0 }
 0xe72   :  { %1931 = vadd.xlane.f32.xlu1 %v1930_v15 }
 0xe78   :  { %v3705_v16 = vpop.eup %3704 }
 0xe79   :  { %v2039_v17 = vsel %vm1657_vm4, %v3705_v16, 0.0 }
 0xe7a   :  { %2040 = vadd.xlane.f32.xlu0 %v2039_v17 }
 0xe7c   :  { %v3707_v18 = vpop.eup %3706 }
 0xe7d   :  { %v1505_v13 = vmul.f32 %v3707_v18, %v1489_v53 }
 0xe7f   :  { %v1514_v19 = vmul.f32 %v4280_v7, %v1505_v13 }
 0xe81   :  { %v4382_v20 = vadd.f32 %v4285_v9, %v1514_v19 }
 0xe83   :  { %1936 = vrot.lane.b32.xlu1 %v4309_v39, %s3878_s4  ;;  %v2239_v21 = vmul.f32 0.35355338, %v4382_v20 }
 0xe85   :  { %v4389_v23 = vpack.c.bf16 %v2239_v21, %v2239_v21 }
 0xe87   :  { %2351 = vrot.lane.b32.xlu1 %v4307_v11, %s3875_s10 }
 0xe8b   :  { %2349 = vrot.lane.b32.xlu1 %v4389_v23, %s3875_s10 }
 0xe8e   :  { %v4393_v24 = vpop.f32.mrf.mxu0 }
 0xe90   :  { %2045 = vrot.lane.b32.xlu0 %v4309_v39, %s3880_s30  ;;  %v3492_v7 = vpop.f32.mrf.mxu0 }
 0xe92   :  { %v1871_v9 = vpop.f32.mrf.mxu0 }
 0xe94   :  { %v3493_v25 = vpop.f32.mrf.mxu0 }
 0xefb   :  { %v1932_v26 = vpop.xlane.xlu1 %1931 }
 0xefc   :  { %3708 = vrcp.f32 %v1932_v26 }
 0xeff   :  { %v1937_v27 = vpop.permute.xlu1 %1936 }
 0xf00   :  { %3501 = vmatpush3.bf16.msra.mxu0 %v1937_v27 }
 0xf01   :  { %3512 = vmatprep.subr.bf16.mxu0 %v3872_v0 }
 0xf03   :  { %v2041_v28 = vpop.xlane.xlu0 %2040  ;;  %v2352_v41 = vpop.permute.xlu1 %2351 }
 0xf04   :  { %3710 = vrcp.f32 %v2041_v28  ;;  %v2357_v42 = vsel %vm220_vm2, %v2352_v41, 0 }
 0xf07   :  { %v2046_v22 = vpop.permute.xlu0 %2045  ;;  %v2350_v14 = vpop.permute.xlu1 %2349 }
 0xf09   :  { %v3709_v29 = vpop.eup %3708 }
 0xf0a   :  { %v1934_v1 = vmul.f32 %v3709_v29, %v3703_v12 }
 0xf0c   :  { %v1935_v31 = vpack.c.bf16 %v1934_v1, %v1934_v1 }
 0xf0e   :  { %3503 = vmatmul.mubr.msk.bf16.vlgmr.msra.gmra.mxu0 %vm1657_vm4, %v1935_v31 }
 0xf0f   :  { %3513 = vmatpush3.bf16.msra.mxu0 %v2046_v22  ;;  %3514 = vmatprep.mubr.msk.bf16.mxu0 %vm3873_vm0, %v3872_v0 }
 0xf10   :  { %3524 = vmatprep.subr.bf16.mxu0 %v3872_v0 }
 0xf11   :  { %v3711_v39 = vpop.eup %3710 }
 0xf12   :  { %v2043_v35 = vmul.f32 %v3711_v39, %v3705_v16 }
 0xf14   :  { %v2044_v36 = vpack.c.bf16 %v2043_v35, %v2043_v35 }
 0xf16   :  { %3515 = vmatmul.mubr.msk.bf16.vlgmr.msra.gmra.mxu0 %vm1657_vm4, %v2044_v36 }
 0xf17   :  { %3525 = vmatpush3.bf16.msra.mxu0 %v4403_v34  ;;  %3526 = vmatprep.mubr.msk.bf16.mxu0 %vm3873_vm0, %v3872_v0 }
 0xf18   :  { %3536 = vmatprep.subr.bf16.mxu0 %v3872_v0 }
 0xf1e   :  { %3527 = vmatmul.mubr.msk.bf16.vlgmr.msra.gmra.mxu0 %vm220_vm2, %v1717_v3 }
 0xf1f   :  { %3537 = vmatpush3.bf16.xpose.msra.mxu0 %v2246_v40  ;;  %3538 = vmatprep.mubr.msk.bf16.mxu0 %vm3873_vm0, %v3872_v0 }
 0xf20   :  { %3548 = vmatprep.subr.bf16.mxu0 %v3872_v0 }
 0xf26   :  { %3539 = vmatmul.mubr.msk.bf16.vlgmr.msra.gmra.mxu0 %vm220_vm2, %v4389_v23 }
 0xf27   :  { %3549 = vmatpush3.bf16.xpose.msra.mxu0 %v2357_v42  ;;  %3550 = vmatprep.mubr.msk.bf16.mxu0 %vm3873_vm0, %v3872_v0 }
 0xf28   :  { %3560 = vmatprep.subr.bf16.mxu0 %v3872_v0 }
 0xf2e   :  { %3551 = vmatmul.mubr.msk.bf16.vlgmr.msra.gmra.mxu0 %vm220_vm2, %v2350_v14 }
 0xf2f   :  { %3561 = vmatpush3.bf16.msra.mxu0 %v4366_v37  ;;  %3562 = vmatprep.mubr.msk.bf16.mxu0 %vm3873_vm0, %v3872_v0 }
 0xf30   :  { %3572 = vmatprep.subr.bf16.mxu0 %v3872_v0 }
 0xfce   :  { %v1976_v45 = vpop.f32.mrf.mxu0 }
 0xfcf   :  { %v1982_v55 = vpack.c.bf16 %v1976_v45, %v1976_v45 }
 0xfd0   :  { %v3504_v46 = vpop.f32.mrf.mxu0 }
 0xfd2   :  { %v1979_v47 = vpop.f32.mrf.mxu0 }
 0xfd4   :  { %v3505_v49 = vpop.f32.mrf.mxu0 }
 0xfd6   :  { %v2085_v51 = vpop.f32.mrf.mxu0 }
 0xfd7   :  { %v2091_v37 = vpack.c.bf16 %v2085_v51, %v2085_v51 }
 0xfd8   :  { %v3516_v52 = vpop.f32.mrf.mxu0 }
 0xfd9   :  { %3521 = vmatmul.mubr.msk.bf16.vlgmr.msra.gmra.mxu1 %vm220_vm2, %v2091_v37 }
 0xfda   :  { %v2088_v30 = vpop.f32.mrf.mxu0  ;;  %3531 = vmatpush3.bf16.msra.mxu1 %v4435_v32  ;;  %3532 = vmatprep.mubr.msk.bf16.mxu1 %vm3873_vm0, %v3872_v0 }
 0xfdb   :  { %3542 = vmatprep.subr.bf16.mxu1 %v3872_v0 }
 0xfdc   :  { %v3517_v53 = vpop.f32.mrf.mxu0 }
 0xfde   :  { %v2178_v54 = vpop.f32.mrf.mxu0 }
 0xfdf   :  { %v2179_v28 = vadd.f32 %v2178_v54, %v4393_v24 }
 0xfe0   :  { %v3528_v57 = vpop.f32.mrf.mxu0 }
 0xfe1   :  { %3533 = vmatmul.mubr.msk.bf16.vlgmr.msra.gmra.mxu1 %vm220_vm2, %v1982_v55 }
 0xfe2   :  { %v2181_v58 = vpop.f32.mrf.mxu0  ;;  %3544 = vmatprep.mubr.msk.bf16.mxu1 %vm3873_vm0, %v3872_v0 }
 0xfe4   :  { %v3529_v59 = vpop.f32.mrf.mxu0 }
 0xfe6   :  { %v2282_v61 = vpop.f32.mrf.mxu0 }
 0xfe7   :  { %v2288_v62 = vsel %vm1657_vm4, %v2282_v61, -inf }
 0xfe8   :  { %2289 = vmax.xlane.f32.xlu0 %v2288_v62  ;;  %v3540_v48 = vpop.f32.mrf.mxu0 }
 0xfea   :  { %v2285_v63 = vpop.f32.mrf.mxu0 }
 0xfec   :  { %v3541_v38 = vpop.f32.mrf.mxu0 }
 0xfee   :  { %v2393_v2 = vpop.f32.mrf.mxu0 }
 0xfef   :  { %v2399_v60 = vsel %vm1657_vm4, %v2393_v2, -inf }
 0xff0   :  { %2400 = vmax.xlane.f32.xlu1 %v2399_v60  ;;  %v3552_v4 = vpop.f32.mrf.mxu0 }
 0xff2   :  { %v2396_v5 = vpop.f32.mrf.mxu0 }
 0xff3   :  { %v4494_v5 = vld [vmem:[%s4591_s11] ss:$0 sm:$0xff] }
 0xff4   :  { %v3553_v6 = vpop.f32.mrf.mxu0 }
0x1001   :  { %2301 = vrot.lane.b32.xlu1 %v4307_v11, %s3874_s27 }
0x1005   :  { %2503 = vrot.lane.b32.xlu1 %v4307_v11, %s3879_s29 }
0x1009   :  { %2501 = vrot.lane.b32.xlu1 %v4389_v23, %s3879_s29 }
0x100d   :  { %2610 = vrot.lane.b32.xlu1 %v4389_v23, %s3881_s0 }
0x1071   :  { %v2290_v8 = vpop.xlane.xlu0 %2289 }
0x1072   :  { %v2291_v56 = vsub.f32 %v2282_v61, %v2290_v8 }
0x1074   :  { %v2292_v12 = vmul.f32 1.442695, %v2291_v56 }
0x1076   :  { %3712 = vpow2.f32 %v2292_v12 }
0x1079   :  { %v2401_v15 = vpop.xlane.xlu1 %2400 }
0x107a   :  { %v2402_v16 = vsub.f32 %v2393_v2, %v2401_v15 }
0x107c   :  { %v2403_v17 = vmul.f32 1.442695, %v2402_v16 }
0x107d   :  { %v2302_v18 = vpop.permute.xlu1 %2301 }
0x107e   :  { %3714 = vpow2.f32 %v2403_v17  ;;  %3543 = vmatpush3.bf16.msra.mxu1 %v2302_v18 }
0x107f   :  { %3554 = vmatprep.subr.bf16.mxu1 %v3872_v0 }
0x1081   :  { %v2504_v14 = vpop.permute.xlu1 %2503 }
0x1082   :  { %v2509_v45 = vsel %vm220_vm2, %v2504_v14, 0 }
0x1083   :  { %v3713_v13 = vpop.eup %3712 }
0x1084   :  { %v2294_v19 = vsel %vm1657_vm4, %v3713_v13, 0.0 }
0x1085   :  { %2295 = vadd.xlane.f32.xlu0 %v2294_v19  ;;  %v2502_v47 = vpop.permute.xlu1 %2501 }
0x1089   :  { %v2611_v50 = vpop.permute.xlu1 %2610 }
0x108b   :  { %v3715_v21 = vpop.eup %3714 }
0x108c   :  { %v2405_v7 = vsel %vm1657_vm4, %v3715_v21, 0.0 }
0x108d   :  { %2406 = vadd.xlane.f32.xlu0 %v2405_v7 }
0x1099   :  { %v2132_v23 = vpop.f32.mrf.mxu1 }
0x109b   :  { %v3522_v9 = vpop.f32.mrf.mxu1 }
0x109d   :  { %v2135_v25 = vpop.f32.mrf.mxu1 }
0x109f   :  { %v3523_v26 = vpop.f32.mrf.mxu1 }
0x10a1   :  { %v2224_v27 = vpop.f32.mrf.mxu1 }
0x10a2   :  { %v2225_v29 = vadd.f32 %v2224_v27, %v2132_v23 }
0x10a3   :  { %v3534_v1 = vpop.f32.mrf.mxu1  ;;  %2411 = vrot.lane.b32.xlu0 %v4307_v11, %s3876_s24 }
0x10a4   :  { %v2230_v31 = vadd.f32 %v2225_v29, %v2179_v28 }
0x10a5   :  { %v2227_v22 = vpop.f32.mrf.mxu1 }
0x10a6   :  { %v2238_v6 = vadd.f32 %v4494_v5, %v2230_v31 }
0x10a7   :  { %v3535_v39 = vpop.f32.mrf.mxu1  ;;  %2612 = vrot.lane.b32.xlu0 %v4307_v11, %s3881_s0 }
0x10a8   :  { %v2850_v8 = vadd.f32 %v2238_v6, %v4289_v10 }
0x10aa   :  { %v2852_v56 = vsel %vm165_vm1, %v2850_v8, 0.0 }
0x110e   :  { %v2296_v33 = vpop.xlane.xlu0 %2295 }
0x110f   :  { %3716 = vrcp.f32 %v2296_v33 }
0x1116   :  { %v2407_v35 = vpop.xlane.xlu0 %2406 }
0x1117   :  { %3718 = vrcp.f32 %v2407_v35 }
0x111a   :  { %v2412_v41 = vpop.permute.xlu0 %2411 }
0x111c   :  { %v3717_v36 = vpop.eup %3716 }
0x111d   :  { %v2298_v3 = vmul.f32 %v3717_v36, %v3713_v13 }
0x111e   :  { %v2613_v46 = vpop.permute.xlu0 %2612 }
0x111f   :  { %v2299_v40 = vpack.c.bf16 %v2298_v3, %v2298_v3  ;;  %v2618_v49 = vsel %vm220_vm2, %v2613_v46, 0 }
0x1121   :  { %3545 = vmatmul.mubr.msk.bf16.vlgmr.msra.gmra.mxu1 %vm1657_vm4, %v2299_v40 }
0x1122   :  { %3555 = vmatpush3.bf16.msra.mxu1 %v2412_v41  ;;  %3556 = vmatprep.mubr.msk.bf16.mxu1 %vm3873_vm0, %v3872_v0 }
0x1123   :  { %3566 = vmatprep.subr.bf16.mxu1 %v3872_v0 }
0x1124   :  { %v3719_v24 = vpop.eup %3718 }
0x1125   :  { %v2409_v42 = vmul.f32 %v3719_v24, %v3715_v21 }
0x1127   :  { %v2410_v43 = vpack.c.bf16 %v2409_v42, %v2409_v42 }
0x1129   :  { %3557 = vmatmul.mubr.msk.bf16.vlgmr.msra.gmra.mxu1 %vm1657_vm4, %v2410_v43 }
0x112a   :  { %3567 = vmatpush3.bf16.xpose.msra.mxu1 %v2509_v45  ;;  %3568 = vmatprep.mubr.msk.bf16.mxu1 %vm3873_vm0, %v3872_v0 }
0x112b   :  { %3578 = vmatprep.subr.bf16.mxu1 %v3872_v0 }
0x1131   :  { %3569 = vmatmul.mubr.msk.bf16.vlgmr.msra.gmra.mxu1 %vm220_vm2, %v2502_v47 }
0x1132   :  { %3579 = vmatpush3.bf16.xpose.msra.mxu1 %v2618_v49  ;;  %3580 = vmatprep.mubr.msk.bf16.mxu1 %vm3873_vm0, %v3872_v0 }
0x1133   :  { %3590 = vmatprep.subr.bf16.mxu1 %v3872_v0 }
0x1139   :  { %3581 = vmatmul.mubr.msk.bf16.vlgmr.msra.gmra.mxu1 %vm220_vm2, %v2611_v50 }
0x113a   :  { %3591 = vmatpush3.bf16.msra.mxu1 %v4430_v44  ;;  %3592 = vmatprep.mubr.msk.bf16.mxu1 %vm3873_vm0, %v3872_v0 }
0x113b   :  { %3602 = vmatprep.subr.bf16.mxu1 %v3872_v0 }
0x11e1   :  { %v4482_v51 = vpop.f32.mrf.mxu1 }
0x11e2   :  { %v2347_v42 = vpack.c.bf16 %v4482_v51, %v4482_v51 }
0x11e3   :  { %v3546_v37 = vpop.f32.mrf.mxu1 }
0x11e5   :  { %v2344_v52 = vpop.f32.mrf.mxu1 }
0x11e7   :  { %v3547_v30 = vpop.f32.mrf.mxu1 }
0x11e9   :  { %v2451_v53 = vpop.f32.mrf.mxu1 }
0x11ea   :  { %v2457_v54 = vpack.c.bf16 %v2451_v53, %v2451_v53 }
0x11eb   :  { %v3558_v55 = vpop.f32.mrf.mxu1 }
0x11ec   :  { %3563 = vmatmul.mubr.msk.bf16.vlgmr.msra.gmra.mxu0 %vm220_vm2, %v2457_v54 }
0x11ed   :  { %v2454_v57 = vpop.f32.mrf.mxu1  ;;  %3574 = vmatprep.mubr.msk.bf16.mxu0 %vm3873_vm0, %v3872_v0 }
0x11ef   :  { %v3559_v44 = vpop.f32.mrf.mxu1 }
0x11f1   :  { %v2545_v58 = vpop.f32.mrf.mxu1 }
0x11f2   :  { %v2551_v59 = vsel %vm1657_vm4, %v2545_v58, -inf }
0x11f3   :  { %2552 = vmax.xlane.f32.xlu0 %v2551_v59  ;;  %v3570_v61 = vpop.f32.mrf.mxu1 }
0x11f5   :  { %v2548_v62 = vpop.f32.mrf.mxu1 }
0x11f7   :  { %v3571_v48 = vpop.f32.mrf.mxu1 }
0x11f9   :  { %v2654_v63 = vpop.f32.mrf.mxu1 }
0x11fa   :  { %v2660_v38 = vsel %vm1657_vm4, %v2654_v63, -inf }
0x11fb   :  { %2661 = vmax.xlane.f32.xlu1 %v2660_v38  ;;  %v3582_v2 = vpop.f32.mrf.mxu1 }
0x11fd   :  { %v2657_v60 = vpop.f32.mrf.mxu1 }
0x11ff   :  { %v3583_v4 = vpop.f32.mrf.mxu1 }
0x120c   :  { %2563 = vrot.lane.b32.xlu1 %v4307_v11, %s3878_s4 }
0x1230   :  { %2853 = vadd.xlane.f32.xlu1 %v2852_v56 }
0x127c   :  { %v2553_v12 = vpop.xlane.xlu0 %2552 }
0x127d   :  { %v2554_v15 = vsub.f32 %v2545_v58, %v2553_v12 }
0x127f   :  { %v2555_v16 = vmul.f32 1.442695, %v2554_v15 }
0x1281   :  { %3720 = vpow2.f32 %v2555_v16  ;;  %v3654_v16 = vld [vmem:[#allocation10 + $0x8] sm:$0xff]  }
0x1284   :  { %v2662_v17 = vpop.xlane.xlu1 %2661 }
0x1285   :  { %v2663_v18 = vsub.f32 %v2654_v63, %v2662_v17  ;;  %v3655_v17 = vld [vmem:[#allocation10] sm:$0xff]  }
0x1287   :  { %v2664_v13 = vmul.f32 1.442695, %v2663_v18 }
0x1288   :  { %v2564_v19 = vpop.permute.xlu1 %2563 }
0x1289   :  { %3722 = vpow2.f32 %v2664_v13  ;;  %3573 = vmatpush3.bf16.msra.mxu0 %v2564_v19 }
0x128a   :  { %3584 = vmatprep.subr.bf16.mxu0 %v3872_v0 }
0x128e   :  { %v3721_v21 = vpop.eup %3720 }
0x128f   :  { %v2557_v7 = vsel %vm1657_vm4, %v3721_v21, 0.0 }
0x1290   :  { %2558 = vadd.xlane.f32.xlu0 %v2557_v7 }
0x1296   :  { %v3723_v10 = vpop.eup %3722 }
0x1297   :  { %v2666_v23 = vsel %vm1657_vm4, %v3723_v10, 0.0 }
0x1298   :  { %2667 = vadd.xlane.f32.xlu0 %v2666_v23 }
0x12ac   :  { %v2495_v9 = vpop.f32.mrf.mxu0 }
0x12ae   :  { %2672 = vrot.lane.b32.xlu0 %v4307_v11, %s3880_s30  ;;  %v3564_v25 = vpop.f32.mrf.mxu0 }
0x12b0   :  { %v2498_v26 = vpop.f32.mrf.mxu0 }
0x12b2   :  { %v3565_v27 = vpop.f32.mrf.mxu0 }
0x12b9   :  { %v2854_v28 = vpop.xlane.xlu1 %2853 }
0x12ba   :  { %v2858_v29 = vmul.f32 0.03125, %v2854_v28  ;;  %v3180_v28 = vld [vmem:[%s4593_s13] ss:$0 sm:$0xff] }
0x12bc   :  { %v4504_v1 = vsub.f32 %v2850_v8, %v2858_v29 }
0x12be   :  { %v2862_v31 = vmul.f32 %v4504_v1, %v4504_v1 }
0x12c0   :  { %v2864_v22 = vsel %vm165_vm1, %v2862_v31, 0.0 }
0x12c1   :  { %2865 = vadd.xlane.f32.xlu1 %v2864_v22 }
0x1319   :  { %v2559_v39 = vpop.xlane.xlu0 %2558 }
0x131a   :  { %3724 = vrcp.f32 %v2559_v39 }
0x1321   :  { %v2668_v33 = vpop.xlane.xlu0 %2667 }
0x1322   :  { %3726 = vrcp.f32 %v2668_v33  ;;  %v3658_v33 = vld [vmem:[%s4596_s16 + $0x8] sm:$0xff]  }
0x1325   :  { %v2673_v3 = vpop.permute.xlu0 %2672 }
0x1327   :  { %v3725_v35 = vpop.eup %3724 }
0x1328   :  { %v2561_v36 = vmul.f32 %v3725_v35, %v3721_v21  ;;  %v3659_v35 = vld [vmem:[%s4596_s16] sm:$0xff]  }
0x132a   :  { %v2562_v11 = vpack.c.bf16 %v2561_v36, %v2561_v36  ;;  %v3181_v36 = vld [vmem:[%s4595_s15] ss:$0 sm:$0xff] }
0x132c   :  { %3575 = vmatmul.mubr.msk.bf16.vlgmr.msra.gmra.mxu0 %vm1657_vm4, %v2562_v11 }
0x132d   :  { %3585 = vmatpush3.bf16.msra.mxu0 %v2673_v3  ;;  %3586 = vmatprep.mubr.msk.bf16.mxu0 %vm3873_vm0, %v3872_v0 }
0x132e   :  { %3596 = vmatprep.subr.bf16.mxu0 %v3872_v0 }
0x132f   :  { %v3727_v40 = vpop.eup %3726 }
0x1330   :  { %v2670_v41 = vmul.f32 %v3727_v40, %v3723_v10 }
0x1332   :  { %v2671_v24 = vpack.c.bf16 %v2670_v41, %v2670_v41 }
0x1334   :  { %3587 = vmatmul.mubr.msk.bf16.vlgmr.msra.gmra.mxu0 %vm1657_vm4, %v2671_v24 }
0x1335   :  { %3597 = vmatpush3.bf16.msra.mxu0 %v4403_v34  ;;  %3598 = vmatprep.mubr.msk.bf16.mxu0 %vm3873_vm0, %v3872_v0 }
0x1336   :  { %3608 = vmatprep.subr.bf16.mxu0 %v3872_v0 }
0x133c   :  { %3599 = vmatmul.mubr.msk.bf16.vlgmr.msra.gmra.mxu0 %vm220_vm2, %v2347_v42 }
0x133d   :  { %3612 = vmatprep.mubr.msk.bf16.mxu0 %vm3873_vm0, %v3872_v0  ;;  %3609 = vmatpush3.bf16.msra.mxu0 %v3654_v16 }
0x133e   :  { %3610 = vmatprep.subr.bf16.mxu0 %v3872_v0 }
0x1341   :  { %3611 = vmatpush3.bf16.msra.mxu0 %v3655_v17 }
0x13ec   :  { %v2603_v14 = vpop.f32.mrf.mxu0 }
0x13ed   :  { %v2609_v52 = vpack.c.bf16 %v2603_v14, %v2603_v14 }
0x13ee   :  { %v3576_v43 = vpop.f32.mrf.mxu0 }
0x13f0   :  { %v2606_v45 = vpop.f32.mrf.mxu0 }
0x13f2   :  { %v3577_v46 = vpop.f32.mrf.mxu0 }
0x13f4   :  { %v2712_v47 = vpop.f32.mrf.mxu0 }
0x13f5   :  { %v2718_v49 = vpack.c.bf16 %v2712_v47, %v2712_v47 }
0x13f6   :  { %v3588_v34 = vpop.f32.mrf.mxu0 }
0x13f7   :  { %3593 = vmatmul.mubr.msk.bf16.vlgmr.msra.gmra.mxu1 %vm220_vm2, %v2718_v49 }
0x13f8   :  { %v2715_v50 = vpop.f32.mrf.mxu0  ;;  %3603 = vmatpush3.bf16.msra.mxu1 %v4435_v32  ;;  %3604 = vmatprep.mubr.msk.bf16.mxu1 %vm3873_vm0, %v3872_v0 }
0x13f9   :  { %3616 = vmatprep.subr.bf16.mxu1 %v3872_v0 }
0x13fa   :  { %v3589_v51 = vpop.f32.mrf.mxu0 }
0x13fc   :  { %v2799_v37 = vpop.f32.mrf.mxu0 }
0x13fd   :  { %v2800_v59 = vadd.f32 %v2799_v37, %v2495_v9  ;;  %v3179_v9 = vld [vmem:[%s4592_s12] ss:$0 sm:$0xff] }
0x13fe   :  { %v3600_v30 = vpop.f32.mrf.mxu0 }
0x13ff   :  { %3605 = vmatmul.mubr.msk.bf16.vlgmr.msra.gmra.mxu1 %vm220_vm2, %v2609_v52 }
0x1400   :  { %v2802_v53 = vpop.f32.mrf.mxu0  ;;  %3624 = vmatprep.mubr.msk.bf16.mxu1 %vm3873_vm0, %v3872_v0 }
0x1402   :  { %v3601_v54 = vpop.f32.mrf.mxu0 }
0x14b7   :  { %v2756_v55 = vpop.f32.mrf.mxu1 }
0x14b9   :  { %v3594_v57 = vpop.f32.mrf.mxu1 }
0x14bb   :  { %v2759_v44 = vpop.f32.mrf.mxu1 }
0x14bd   :  { %v3595_v32 = vpop.f32.mrf.mxu1 }
0x14bf   :  { %v2842_v58 = vpop.f32.mrf.mxu1 }
0x14c0   :  { %v2843_v61 = vadd.f32 %v2842_v58, %v2756_v55 }
0x14c1   :  { %v3606_v62 = vpop.f32.mrf.mxu1 }
0x14c2   :  { %v2848_v48 = vadd.f32 %v2843_v61, %v2800_v59 }
0x14c3   :  { %v2845_v63 = vpop.f32.mrf.mxu1 }
0x14c4   :  { %v2849_v38 = vadd.f32 %v4494_v5, %v2848_v48  ;;  %v2866_v5 = vpop.xlane.xlu1 %2865 }
0x14c5   :  { %v3607_v2 = vpop.f32.mrf.mxu1  ;;  %v2870_v18 = vmul.f32 0.03125, %v2866_v5 }
0x14c6   :  { %v2851_v60 = vadd.f32 %v2849_v38, %v4382_v20  ;;  %v3656_v20 = vld [vmem:[%s4596_s16 + $0x18] sm:$0xff]  }
0x14c7   :  { %3617 = vmatpush3.bf16.msra.mxu1 %v3656_v20  ;;  %v2872_v13 = vadd.f32 1e-05, %v2870_v18 }
0x14c8   :  { %v2855_v4 = vsel %vm165_vm1, %v2851_v60, 0.0  ;;  %3618 = vmatprep.subr.bf16.mxu1 %v3872_v0 }
0x14c9   :  { %2856 = vadd.xlane.f32.xlu0 %v2855_v4  ;;  %3728 = vrsqrt.f32 %v2872_v13 }
0x14d6   :  { %v3729_v10 = vpop.eup %3728 }
0x14d7   :  { %v2876_v23 = vmul.f32 %v3729_v10, %v4504_v1  ;;  %v3657_v1 = vld [vmem:[%s4596_s16 + $0x10] sm:$0xff]  }
0x14d8   :  { %3619 = vmatpush3.bf16.msra.mxu1 %v3657_v1 }
0x14d9   :  { %v2885_v27 = vmul.f32 %v3179_v9, %v2876_v23  ;;  %3620 = vmatprep.subr.bf16.mxu1 %v3872_v0 }
0x14db   :  { %v2894_v31 = vadd.f32 %v3180_v28, %v2885_v27 }
0x14dc   :  { %3621 = vmatpush3.bf16.msra.mxu1 %v3658_v33 }
0x14dd   :  { %3622 = vmatprep.subr.bf16.mxu1 %v3872_v0  ;;  %v3185_v0 = vld [vmem:[%s4597_s17] ss:$0 sm:$0xff] }
0x14e0   :  { %3623 = vmatpush3.bf16.msra.mxu1 %v3659_v35 }
0x1552   :  { %v2857_v6 = vpop.xlane.xlu0 %2856 }
0x1553   :  { %v2859_v8 = vmul.f32 0.03125, %v2857_v6 }
0x1555   :  { %v2861_v56 = vsub.f32 %v2851_v60, %v2859_v8 }
0x1557   :  { %v2863_v12 = vmul.f32 %v2861_v56, %v2861_v56 }
0x1559   :  { %v2867_v15 = vsel %vm165_vm1, %v2863_v12, 0.0 }
0x155a   :  { %2868 = vadd.xlane.f32.xlu0 %v2867_v15  ;;  %v3192_v15 = vld [vmem:[%s4599_s19] ss:$0 sm:$0xff] }
0x15e3   :  { %v2869_v19 = vpop.xlane.xlu0 %2868 }
0x15e4   :  { %v2871_v21 = vmul.f32 0.03125, %v2869_v19 }
0x15e6   :  { %v2873_v7 = vadd.f32 1e-05, %v2871_v21 }
0x15e8   :  { %3730 = vrsqrt.f32 %v2873_v7 }
0x15f5   :  { %v3731_v25 = vpop.eup %3730 }
0x15f6   :  { %v2877_v26 = vmul.f32 %v3731_v25, %v2861_v56  ;;  %v3191_v56 = vld [vmem:[%s4598_s18] ss:$0 sm:$0xff] }
0x15f8   :  { %v2886_v29 = vmul.f32 %v3179_v9, %v2877_v26 }
0x15fa   :  { %v2895_v22 = vadd.f32 %v3180_v28, %v2886_v29 }
0x15fc   :  { %v2900_v39 = vpack.c.bf16 %v2895_v22, %v2894_v31 }
0x15fe   :  { %3613 = vmatmul.mubr.msk.bf16.vlgmr.msra.gmra.mxu0 %vm165_vm1, %v2900_v39 }
0x16be   :  { %v2957_v11 = vpop.f32.mrf.mxu0 }
0x16bf   :  { %v2958_v40 = vadd.f32 %v3181_v36, %v2957_v11 }
0x16c0   :  { %v3614_v3 = vpop.f32.mrf.mxu0 }
0x16c1   :  { %v2964_v14 = vmax.f32 %v2958_v40, 0.0 }
0x16c2   :  { %v2960_v41 = vpop.f32.mrf.mxu0 }
0x16c3   :  { %v2961_v24 = vadd.f32 %v3181_v36, %v2960_v41 }
0x16c4   :  { %v3615_v42 = vpop.f32.mrf.mxu0 }
0x16c5   :  { %v2965_v43 = vmax.f32 %v2961_v24, 0.0 }
0x16c7   :  { %v2974_v45 = vpack.c.bf16 %v2965_v43, %v2964_v14 }
0x16c9   :  { %3625 = vmatmul.mubr.msk.bf16.vlgmr.msra.gmra.mxu1 %vm3006_vm5, %v2974_v45 }
0x1789   :  { %v3044_v46 = vpop.f32.mrf.mxu1 }
0x178a   :  { %v3045_v47 = vadd.f32 %v3185_v0, %v3044_v46 }
0x178b   :  { %v3626_v49 = vpop.f32.mrf.mxu1 }
0x178c   :  { %v3051_v34 = vadd.f32 %v3045_v47, %v2894_v31 }
0x178d   :  { %v3047_v50 = vpop.f32.mrf.mxu1 }
0x178e   :  { %v3048_v51 = vadd.f32 %v3185_v0, %v3047_v50  ;;  %v3053_v37 = vsel %vm165_vm1, %v3051_v34, 0.0 }
0x178f   :  { %3054 = vadd.xlane.f32.xlu1 %v3053_v37  ;;  %v3627_v52 = vpop.f32.mrf.mxu1 }
0x1790   :  { %v3052_v30 = vadd.f32 %v3048_v51, %v2895_v22 }
0x1792   :  { %v3056_v53 = vsel %vm165_vm1, %v3052_v30, 0.0 }
0x1793   :  { %3057 = vadd.xlane.f32.xlu0 %v3056_v53 }
0x1818   :  { %v3055_v54 = vpop.xlane.xlu1 %3054 }
0x1819   :  { %v3059_v55 = vmul.f32 0.03125, %v3055_v54 }
0x181b   :  { %v3061_v57 = vsub.f32 %v3051_v34, %v3059_v55 }
0x181c   :  { %v3058_v44 = vpop.xlane.xlu0 %3057 }
0x181d   :  { %v3060_v32 = vmul.f32 0.03125, %v3058_v44  ;;  %v3063_v58 = vmul.f32 %v3061_v57, %v3061_v57 }
0x181f   :  { %v3062_v59 = vsub.f32 %v3052_v30, %v3060_v32  ;;  %v3065_v61 = vsel %vm165_vm1, %v3063_v58, 0.0 }
0x1820   :  { %3066 = vadd.xlane.f32.xlu1 %v3065_v61 }
0x1821   :  { %v3064_v62 = vmul.f32 %v3062_v59, %v3062_v59 }
0x1823   :  { %v3068_v48 = vsel %vm165_vm1, %v3064_v62, 0.0 }
0x1824   :  { %3069 = vadd.xlane.f32.xlu0 %v3068_v48 }
0x18a9   :  { %v3067_v63 = vpop.xlane.xlu1 %3066 }
0x18aa   :  { %v3071_v38 = vmul.f32 0.03125, %v3067_v63 }
0x18ac   :  { %v3073_v2 = vadd.f32 1e-05, %v3071_v38 }
0x18ad   :  { %v3070_v60 = vpop.xlane.xlu0 %3069 }
0x18ae   :  { %3732 = vrsqrt.f32 %v3073_v2  ;;  %v3072_v4 = vmul.f32 0.03125, %v3070_v60 }
0x18b0   :  { %v3074_v6 = vadd.f32 1e-05, %v3072_v4 }
0x18b2   :  { %3734 = vrsqrt.f32 %v3074_v6 }
0x18bb   :  { %v3733_v8 = vpop.eup %3732 }
0x18bc   :  { %v3077_v12 = vmul.f32 %v3733_v8, %v3061_v57 }
0x18be   :  { %v3086_v16 = vmul.f32 %v3191_v56, %v3077_v12 }
0x18bf   :  { %v3735_v17 = vpop.eup %3734 }
0x18c0   :  { %v3078_v20 = vmul.f32 %v3735_v17, %v3062_v59  ;;  %v3095_v5 = vadd.f32 %v3192_v15, %v3086_v16 }
0x18c2   :  { %v3087_v18 = vmul.f32 %v3191_v56, %v3078_v20  ;;  %3097 = vst.msk [vmem:[#allocation11] sm:$0xff] %vm165_vm1, %v3095_v5 }
0x18c4   :  { %v3096_v13 = vadd.f32 %v3192_v15, %v3087_v18 }
0x18c6   :  { %3098 = vst.msk [vmem:[#allocation11 + $0x8] sm:$0xff] %vm165_vm1, %v3096_v13 }
0x18c7   :  { %3848 = shalt.err (!%p3845_p1)
}
0x18c8   :  { %s3885_s18 = smov 128   ;;  %s3886_s19 = smov 8  }
0x18c9   :  { %3110 = dma.vmem_to_hbm [thread:$0]  %s3105_s1, 256, %s4600_s20, [#allocation4], %s3885_s18, %s3885_s18, %s3886_s19  }
0x18ca   :  { %3863 = dma.done.wait [#allocation4], 256  }
0x18cb   :  { %3864 = vsyncadd [#allocation4], 4294967040 }
0x18cc   :  { %3114 = vsyncpa [#allocation3], 1 }
0x18cd   :  { %3115 = vsyncpa [#allocation6], 1 }
0x18ce   :  { %3116 = vsyncpa [#allocation9], 1 }
0x18cf   :  { %3117 = vsyncpa [#allocation4], 1 }

</bundles_post_ra>
